<compile_context>
chip_gen: v6e
topology: v6e:2x2x1
jax: 0.10.0
libtpu: 0.0.40
codegen_flags: <defaults>
</compile_context>

<pallas_src>
import jax
import jax.numpy as jnp
from jax.experimental import pallas as pl
from jax.experimental.pallas import tpu as pltpu

# ---- "config" / "num_sequence" constants (synthetic, deterministic) ----
PAD = 0
SOS = 2
VOCAB_SIZE = 16          # len(num_sequence)
EMBEDDING_DIM = 32       # config.embedding_dim
HIDDEN_SIZE = 32         # config.hidden_size
MAX_LEN = 8              # config.max_len
BATCH_SIZE = 4           # config.batch_size


def decoder_kernel(tf_ref,    # SMEM prefetch: (T,) int32 teacher-forcing flags
                   w_ref,     # (V+2H, 4H) bf16: rows [0:V)=W_top (emb-folded W_ih + all gate
                              #   biases), [V:V+H)=W_bot (W_hh), [V+H:V+2H) lanes[0:V)=W_fc^T
                   hb_ref,    # (B+1, H) f32: rows [0:B)=h0, row B lanes[0:V)=b_fc
                   tgt_ref,   # (B, T) int32 teacher targets
                   out_ref):  # (B, T*V + H) f32: per-step log-probs then final hidden
    Bp1, H = hb_ref.shape
    B = Bp1 - 1
    T = tgt_ref.shape[1]
    V = w_ref.shape[0] - 2 * H
    cdt = w_ref.dtype                       # MXU operand dtype (bf16)

    # ---- loop-invariant hoists ----
    w_top = w_ref[0:V, :]                   # (V, 4H)  one-hot side, biases folded into rows
    w_bot = w_ref[V:V + H, :]               # (H, 4H)  hidden side
    w_fc = w_ref[V + H:V + 2 * H, 0:V]      # (H, V)
    h = hb_ref[0:B, :]                      # (B, H) f32 carry
    b_fc = jnp.broadcast_to(hb_ref[B:B + 1, 0:V], (B, V))   # hoisted broadcast (no per-step bcast)
    tgt = tgt_ref[...]                      # (B, T) int32

    lane = jax.lax.broadcasted_iota(jnp.int32, (B, V), 1)
    rev_lane = (V - 1) - lane               # low-bit tie-break key: larger == lower lane
    lo_mask = jnp.int32(V - 1)              # 0xF
    hi_mask = ~lo_mask                      # -16
    sgn_fix = jnp.int32(0x7FFFFFFF)

    # teacher-forcing one-hots, built in-kernel, independent of the recurrence (VPU slack)
    tgt_oh = [(lane == tgt[:, t:t + 1]).astype(cdt) for t in range(T)]

    h_b = h.astype(cdt)                     # single bf16 cast of h, reused for both dots
    oh = (lane == SOS).astype(cdt)          # initial decoder_input = SOS, directly bf16

    # fully-unrolled decode loop (T small & static); all indices static.
    for t in range(T):
        # ---- split gate matmul (no lane concat): g columns [r, z, n_i, n_h], biases in w_top
        g = (jnp.dot(oh, w_top, preferred_element_type=jnp.float32) +
             jnp.dot(h_b, w_bot, preferred_element_type=jnp.float32))      # (B, 4H) f32
        r = jax.nn.sigmoid(g[:, 0 * H:1 * H])
        z = jax.nn.sigmoid(g[:, 1 * H:2 * H])
        n = jnp.tanh(g[:, 2 * H:3 * H] + r * g[:, 3 * H:4 * H])            # b_hn inside r*(...)
        h = (1.0 - z) * n + z * h                                          # (B, H) f32
        h_b = h.astype(cdt)

        # ---- fc (feeds both the output log-probs and the greedy next input) ----
        logits = jnp.dot(h_b, w_fc, preferred_element_type=jnp.float32) + b_fc   # (B, V) f32

        # ---- greedy argmax via ONE packed-key reduction (first-max tie-break like topk) ----
        ibits = pltpu.bitcast(logits, jnp.int32)
        key = jnp.where(ibits < 0, ibits ^ sgn_fix, ibits)    # order-preserving int32 key
        key = (key & hi_mask) | rev_lane                      # low 4 bits: V-1-lane
        kmax = jnp.max(key, axis=-1, keepdims=True)           # (B, 1)
        idx = (V - 1) - (kmax & lo_mask)                      # (B, 1) argmax lane
        oh_greedy = (lane == idx).astype(cdt)
        oh = jnp.where(tf_ref[t] == 1, tgt_oh[t], oh_greedy)  # teacher forcing vs greedy

        # ---- log_softmax: off the recurrent chain (independent max reduce) ----
        m = jnp.max(logits, axis=-1, keepdims=True)
        lse = jnp.log(jnp.sum(jnp.exp(logits - m), axis=-1, keepdims=True))
        out_ref[:, t * V:(t + 1) * V] = logits - m - lse       # small masked store, hidden

    out_ref[:, T * V:T * V + H] = h                             # final hidden


@jax.jit
def num_decoder_forward(w_all, b_fc_row, encoder_hidden, target, tf_flags):
    """encoder_hidden: (1, B, H) f32; target: (B, T) int32; tf_flags: (T,) int32."""
    B, T = target.shape
    H = encoder_hidden.shape[-1]
    V = w_all.shape[0] - 2 * H

    h0 = encoder_hidden[0]                                         # (B, H)
    # pack {h0, b_fc} into one tiny f32 block -> one DMA
    hb = (jnp.zeros((B + 1, H), jnp.float32)
          .at[:B, :].set(h0)
          .at[B, :V].set(b_fc_row[0]))

    grid_spec = pltpu.PrefetchScalarGridSpec(
        num_scalar_prefetch=1,
        grid=(1,),
        in_specs=[
            pl.BlockSpec((V + 2 * H, 4 * H), lambda i, tf: (0, 0)),  # all bf16 weights
            pl.BlockSpec((B + 1, H), lambda i, tf: (0, 0)),          # h0 + b_fc (f32)
            pl.BlockSpec((B, T), lambda i, tf: (0, 0)),              # targets (int32)
        ],
        out_specs=pl.BlockSpec((B, T * V + H), lambda i, tf: (0, 0)),  # fused lane-dense out
    )

    out = pl.pallas_call(
        decoder_kernel,
        out_shape=jax.ShapeDtypeStruct((B, T * V + H), jnp.float32),
        grid_spec=grid_spec,
        compiler_params=pltpu.CompilerParams(dimension_semantics=("arbitrary",)),
    )(tf_flags, w_all, hb, target.astype(jnp.int32))

    decoder_outputs = out[:, :T * V].reshape(B, T, V)              # (B, T, V) batch-first
    decoder_hidden = out[:, T * V:][None]                          # (1, B, H)
    return decoder_outputs, decoder_hidden


def make_params(key):
    """Raw parameters in PyTorch layout."""
    kE, k1, k2, k3, k4, k5, k6 = jax.random.split(key, 7)
    V, E, H = VOCAB_SIZE, EMBEDDING_DIM, HIDDEN_SIZE
    emb = 0.1 * jax.random.normal(kE, (V, E), jnp.float32)
    emb = emb.at[PAD].set(0.0)                                     # padding_idx=PAD
    w_ih = 0.1 * jax.random.normal(k1, (3 * H, E), jnp.float32)    # (3H, E), gates [r;z;n]
    w_hh = 0.1 * jax.random.normal(k2, (3 * H, H), jnp.float32)
    b_ih = 0.1 * jax.random.normal(k3, (3 * H,), jnp.float32)
    b_hh = 0.1 * jax.random.normal(k4, (3 * H,), jnp.float32)
    w_fc = 0.1 * jax.random.normal(k5, (V, H), jnp.float32)        # Linear (out, in)
    b_fc = 0.1 * jax.random.normal(k6, (V,), jnp.float32)
    return emb, w_ih, w_hh, b_ih, b_hh, w_fc, b_fc


def fuse_params(params, compute_dtype=jnp.bfloat16):
    """Fold embedding into W_ih, fold ALL gate biases into W_top rows (exact in f32 because
    decoder inputs are one-hots summing to 1), pack {W_top, W_bot, W_fc^T} into one bf16
    buffer; keep b_fc separate in f32 (added after the f32-accumulated fc matmul)."""
    emb, w_ih, w_hh, b_ih, b_hh, w_fc, b_fc = params
    V, _ = emb.shape
    H = w_hh.shape[1]
    assert V <= H, "b_fc packing assumes V <= H"

    w_ei = emb @ w_ih.T                                            # (V, 3H), exact f32 fold
    w_hh_t = w_hh.T                                                # (H, 3H)
    # gate-bias row: columns [b_ir+b_hr, b_iz+b_hz, b_in, b_hn] (b_hn stays in the r*() term)
    bias_row = jnp.concatenate([
        b_ih[0:H] + b_hh[0:H],
        b_ih[H:2 * H] + b_hh[H:2 * H],
        b_ih[2 * H:3 * H],
        b_hh[2 * H:3 * H],
    ])[None, :]                                                    # (1, 4H)
    # W_top: input/one-hot side, columns [r_i, z_i, n_i, 0], bias folded into every row
    w_top = jnp.concatenate([w_ei, jnp.zeros((V, H), jnp.float32)], axis=1) + bias_row
    # W_bot: hidden side, columns [r_h, z_h, 0, n_h]
    w_bot = jnp.concatenate([w_hh_t[:, 0:H], w_hh_t[:, H:2 * H],
                             jnp.zeros((H, H), jnp.float32), w_hh_t[:, 2 * H:3 * H]], axis=1)
    # W_fc^T padded to 4H lanes so all weights live in one buffer
    w_fc_pad = jnp.zeros((H, 4 * H), jnp.float32).at[:, 0:V].set(w_fc.T)
    w_all = jnp.concatenate([w_top, w_bot, w_fc_pad], axis=0).astype(compute_dtype)  # (V+2H, 4H)
    b_fc_row = b_fc[None, :].astype(jnp.float32)                   # (1, V)
    return w_all, b_fc_row


if __name__ == "__main__":
    key = jax.random.PRNGKey(0)
    kp, kh, kt, kf = jax.random.split(key, 4)

    params = make_params(kp)
    w_all, b_fc_row = fuse_params(params)
    encoder_hidden = jax.random.normal(kh, (1, BATCH_SIZE, HIDDEN_SIZE), jnp.float32)
    target = jax.random.randint(kt, (BATCH_SIZE, MAX_LEN), 0, VOCAB_SIZE, jnp.int32)
    target_length = jnp.full((BATCH_SIZE,), MAX_LEN, jnp.int32)    # unused (as in PyTorch)
    tf_flags = jax.random.bernoulli(kf, 0.5, (MAX_LEN,)).astype(jnp.int32)

    decoder_outputs, decoder_hidden = num_decoder_forward(
        w_all, b_fc_row, encoder_hidden, target, tf_flags)
    jax.block_until_ready((decoder_outputs, decoder_hidden))

    assert decoder_outputs.shape == (BATCH_SIZE, MAX_LEN, VOCAB_SIZE)
    assert decoder_hidden.shape == (1, BATCH_SIZE, HIDDEN_SIZE)
    assert bool(jnp.all(jnp.isfinite(decoder_outputs)))
    # log_softmax rows should sum to ~1 in prob space
    assert jnp.allclose(jnp.exp(decoder_outputs).sum(-1), 1.0, atol=1e-4)
    print("KERNEL_OK")
</pallas_src>

<mosaic_0001>
module attributes {stable_mosaic.version = 11 : i64} {
  func.func @decoder_kernel(%arg0: i32, %arg1: memref<8xi32, #tpu.memory_space<smem>>, %arg2: memref<80x128xbf16, #tpu.memory_space<vmem>>, %arg3: memref<5x32xf32, #tpu.memory_space<vmem>>, %arg4: memref<4x8xi32, #tpu.memory_space<vmem>>, %arg5: memref<4x160xf32, #tpu.memory_space<vmem>>) attributes {dimension_semantics = [#tpu.dimension_semantics<arbitrary>], iteration_bounds = array<i64: 1>, scalar_prefetch = 1 : i64, scratch_operands = 0 : i64, tpu.core_type = #tpu.core_type<tc>, window_params = [{pipeline_mode = #tpu.pipeline_mode<synchronous>, transform_indices = @transform_0, window_bounds = array<i64: 80, 128>}, {pipeline_mode = #tpu.pipeline_mode<synchronous>, transform_indices = @transform_1, window_bounds = array<i64: 5, 32>}, {pipeline_mode = #tpu.pipeline_mode<synchronous>, transform_indices = @transform_2, window_bounds = array<i64: 4, 8>}, {pipeline_mode = #tpu.pipeline_mode<synchronous>, transform_indices = @transform_3, window_bounds = array<i64: 4, 160>}]} {
    %c0 = arith.constant 0 : index
    %c0_0 = arith.constant 0 : index
    %0 = vector.load %arg2[%c0, %c0_0] : memref<80x128xbf16, #tpu.memory_space<vmem>>, vector<16x128xbf16>
    %c16 = arith.constant 16 : index
    %c0_1 = arith.constant 0 : index
    %1 = vector.load %arg2[%c16, %c0_1] : memref<80x128xbf16, #tpu.memory_space<vmem>>, vector<32x128xbf16>
    %c48 = arith.constant 48 : index
    %c0_2 = arith.constant 0 : index
    %2 = vector.load %arg2[%c48, %c0_2] : memref<80x128xbf16, #tpu.memory_space<vmem>>, vector<32x16xbf16>
    %c0_3 = arith.constant 0 : index
    %c0_4 = arith.constant 0 : index
    %3 = vector.load %arg3[%c0_3, %c0_4] : memref<5x32xf32, #tpu.memory_space<vmem>>, vector<4x32xf32>
    %c4 = arith.constant 4 : index
    %c0_5 = arith.constant 0 : index
    %4 = vector.load %arg3[%c4, %c0_5] : memref<5x32xf32, #tpu.memory_space<vmem>>, vector<1x16xf32>
    %5 = vector.shape_cast %4 : vector<1x16xf32> to vector<1x16xf32>
    %6 = vector.broadcast %5 : vector<1x16xf32> to vector<4x16xf32>
    %c0_6 = arith.constant 0 : index
    %c0_7 = arith.constant 0 : index
    %7 = vector.load %arg4[%c0_6, %c0_7] : memref<4x8xi32, #tpu.memory_space<vmem>>, vector<4x8xi32>
    %8 = tpu.iota {dimensions = array<i32: 1>} : vector<4x16xi32>
    %c15_i32 = arith.constant 15 : i32
    %9 = vector.broadcast %c15_i32 : i32 to vector<4x16xi32>
    %10 = arith.subi %9, %8 : vector<4x16xi32>
    %c15_i32_8 = arith.constant 15 : i32
    %c-1_i32 = arith.constant -1 : i32
    %11 = arith.xori %c15_i32_8, %c-1_i32 : i32
    %12 = vector.extract_strided_slice %7 {offsets = [0, 0], sizes = [4, 1], strides = [1, 1]} : vector<4x8xi32> to vector<4x1xi32>
    %13 = vector.broadcast %12 : vector<4x1xi32> to vector<4x16xi32>
    %14 = arith.cmpi eq, %8, %13 : vector<4x16xi32>
    %15 = arith.extui %14 : vector<4x16xi1> to vector<4x16xi32>
    %16 = arith.sitofp %15 : vector<4x16xi32> to vector<4x16xf32>
    %17 = arith.truncf %16 : vector<4x16xf32> to vector<4x16xbf16>
    %18 = vector.extract_strided_slice %7 {offsets = [0, 1], sizes = [4, 1], strides = [1, 1]} : vector<4x8xi32> to vector<4x1xi32>
    %19 = vector.broadcast %18 : vector<4x1xi32> to vector<4x16xi32>
    %20 = arith.cmpi eq, %8, %19 : vector<4x16xi32>
    %21 = arith.extui %20 : vector<4x16xi1> to vector<4x16xi32>
    %22 = arith.sitofp %21 : vector<4x16xi32> to vector<4x16xf32>
    %23 = arith.truncf %22 : vector<4x16xf32> to vector<4x16xbf16>
    %24 = vector.extract_strided_slice %7 {offsets = [0, 2], sizes = [4, 1], strides = [1, 1]} : vector<4x8xi32> to vector<4x1xi32>
    %25 = vector.broadcast %24 : vector<4x1xi32> to vector<4x16xi32>
    %26 = arith.cmpi eq, %8, %25 : vector<4x16xi32>
    %27 = arith.extui %26 : vector<4x16xi1> to vector<4x16xi32>
    %28 = arith.sitofp %27 : vector<4x16xi32> to vector<4x16xf32>
    %29 = arith.truncf %28 : vector<4x16xf32> to vector<4x16xbf16>
    %30 = vector.extract_strided_slice %7 {offsets = [0, 3], sizes = [4, 1], strides = [1, 1]} : vector<4x8xi32> to vector<4x1xi32>
    %31 = vector.broadcast %30 : vector<4x1xi32> to vector<4x16xi32>
    %32 = arith.cmpi eq, %8, %31 : vector<4x16xi32>
    %33 = arith.extui %32 : vector<4x16xi1> to vector<4x16xi32>
    %34 = arith.sitofp %33 : vector<4x16xi32> to vector<4x16xf32>
    %35 = arith.truncf %34 : vector<4x16xf32> to vector<4x16xbf16>
    %36 = vector.extract_strided_slice %7 {offsets = [0, 4], sizes = [4, 1], strides = [1, 1]} : vector<4x8xi32> to vector<4x1xi32>
    %37 = vector.broadcast %36 : vector<4x1xi32> to vector<4x16xi32>
    %38 = arith.cmpi eq, %8, %37 : vector<4x16xi32>
    %39 = arith.extui %38 : vector<4x16xi1> to vector<4x16xi32>
    %40 = arith.sitofp %39 : vector<4x16xi32> to vector<4x16xf32>
    %41 = arith.truncf %40 : vector<4x16xf32> to vector<4x16xbf16>
    %42 = vector.extract_strided_slice %7 {offsets = [0, 5], sizes = [4, 1], strides = [1, 1]} : vector<4x8xi32> to vector<4x1xi32>
    %43 = vector.broadcast %42 : vector<4x1xi32> to vector<4x16xi32>
    %44 = arith.cmpi eq, %8, %43 : vector<4x16xi32>
    %45 = arith.extui %44 : vector<4x16xi1> to vector<4x16xi32>
    %46 = arith.sitofp %45 : vector<4x16xi32> to vector<4x16xf32>
    %47 = arith.truncf %46 : vector<4x16xf32> to vector<4x16xbf16>
    %48 = vector.extract_strided_slice %7 {offsets = [0, 6], sizes = [4, 1], strides = [1, 1]} : vector<4x8xi32> to vector<4x1xi32>
    %49 = vector.broadcast %48 : vector<4x1xi32> to vector<4x16xi32>
    %50 = arith.cmpi eq, %8, %49 : vector<4x16xi32>
    %51 = arith.extui %50 : vector<4x16xi1> to vector<4x16xi32>
    %52 = arith.sitofp %51 : vector<4x16xi32> to vector<4x16xf32>
    %53 = arith.truncf %52 : vector<4x16xf32> to vector<4x16xbf16>
    %54 = arith.truncf %3 : vector<4x32xf32> to vector<4x32xbf16>
    %c2_i32 = arith.constant 2 : i32
    %55 = vector.broadcast %c2_i32 : i32 to vector<4x16xi32>
    %56 = arith.cmpi eq, %8, %55 : vector<4x16xi32>
    %57 = arith.extui %56 : vector<4x16xi1> to vector<4x16xi32>
    %58 = arith.sitofp %57 : vector<4x16xi32> to vector<4x16xf32>
    %59 = arith.truncf %58 : vector<4x16xf32> to vector<4x16xbf16>
    %cst = arith.constant dense<0.000000e+00> : vector<4x128xf32>
    %60 = tpu.matmul %59, %0, %cst {dimension_numbers = #tpu.dot_dimension_numbers<[1], [0], [0], [1], [0, 0, 1, 1], [], []>} : vector<4x16xbf16>, vector<16x128xbf16>, vector<4x128xf32> -> vector<4x128xf32>
    %cst_9 = arith.constant dense<0.000000e+00> : vector<4x128xf32>
    %61 = tpu.matmul %54, %1, %cst_9 {dimension_numbers = #tpu.dot_dimension_numbers<[1], [0], [0], [1], [0, 0, 1, 1], [], []>} : vector<4x32xbf16>, vector<32x128xbf16>, vector<4x128xf32> -> vector<4x128xf32>
    %62 = arith.addf %60, %61 : vector<4x128xf32>
    %63 = vector.extract_strided_slice %62 {offsets = [0, 0], sizes = [4, 32], strides = [1, 1]} : vector<4x128xf32> to vector<4x32xf32>
    %64 = arith.negf %63 : vector<4x32xf32>
    %65 = math.exp %64 : vector<4x32xf32>
    %cst_10 = arith.constant 1.000000e+00 : f32
    %66 = vector.broadcast %cst_10 : f32 to vector<4x32xf32>
    %67 = arith.addf %66, %65 : vector<4x32xf32>
    %68 = arith.divf %66, %67 : vector<4x32xf32>
    %69 = vector.extract_strided_slice %62 {offsets = [0, 32], sizes = [4, 32], strides = [1, 1]} : vector<4x128xf32> to vector<4x32xf32>
    %70 = arith.negf %69 : vector<4x32xf32>
    %71 = math.exp %70 : vector<4x32xf32>
    %cst_11 = arith.constant 1.000000e+00 : f32
    %72 = vector.broadcast %cst_11 : f32 to vector<4x32xf32>
    %73 = arith.addf %72, %71 : vector<4x32xf32>
    %74 = arith.divf %72, %73 : vector<4x32xf32>
    %75 = vector.extract_strided_slice %62 {offsets = [0, 64], sizes = [4, 32], strides = [1, 1]} : vector<4x128xf32> to vector<4x32xf32>
    %76 = vector.extract_strided_slice %62 {offsets = [0, 96], sizes = [4, 32], strides = [1, 1]} : vector<4x128xf32> to vector<4x32xf32>
    %77 = arith.mulf %68, %76 : vector<4x32xf32>
    %78 = arith.addf %75, %77 : vector<4x32xf32>
    %79 = math.tanh %78 : vector<4x32xf32>
    %cst_12 = arith.constant 1.000000e+00 : f32
    %80 = vector.broadcast %cst_12 : f32 to vector<4x32xf32>
    %81 = arith.subf %80, %74 : vector<4x32xf32>
    %82 = arith.mulf %81, %79 : vector<4x32xf32>
    %83 = arith.mulf %74, %3 : vector<4x32xf32>
    %84 = arith.addf %82, %83 : vector<4x32xf32>
    %85 = arith.truncf %84 : vector<4x32xf32> to vector<4x32xbf16>
    %cst_13 = arith.constant dense<0.000000e+00> : vector<4x16xf32>
    %86 = tpu.matmul %85, %2, %cst_13 {dimension_numbers = #tpu.dot_dimension_numbers<[1], [0], [0], [1], [0, 0, 1, 1], [], []>} : vector<4x32xbf16>, vector<32x16xbf16>, vector<4x16xf32> -> vector<4x16xf32>
    %87 = arith.addf %86, %6 : vector<4x16xf32>
    %88 = tpu.bitcast %87 : vector<4x16xf32> -> vector<4x16xi32>
    %c0_i32 = arith.constant 0 : i32
    %89 = vector.broadcast %c0_i32 : i32 to vector<4x16xi32>
    %90 = arith.cmpi slt, %88, %89 : vector<4x16xi32>
    %c2147483647_i32 = arith.constant 2147483647 : i32
    %91 = vector.broadcast %c2147483647_i32 : i32 to vector<4x16xi32>
    %92 = arith.xori %88, %91 : vector<4x16xi32>
    %93 = arith.select %90, %92, %88 : vector<4x16xi1>, vector<4x16xi32>
    %94 = vector.broadcast %11 : i32 to vector<4x16xi32>
    %95 = arith.andi %93, %94 : vector<4x16xi32>
    %96 = arith.ori %95, %10 : vector<4x16xi32>
    %cst_14 = arith.constant dense<-2147483648> : vector<4xi32>
    %97 = vector.multi_reduction <maxsi>, %96, %cst_14 [1] : vector<4x16xi32> to vector<4xi32>
    %98 = vector.shape_cast %97 : vector<4xi32> to vector<4x1xi32>
    %c15_i32_15 = arith.constant 15 : i32
    %99 = vector.broadcast %c15_i32_15 : i32 to vector<4x1xi32>
    %100 = arith.andi %98, %99 : vector<4x1xi32>
    %c15_i32_16 = arith.constant 15 : i32
    %101 = vector.broadcast %c15_i32_16 : i32 to vector<4x1xi32>
    %102 = arith.subi %101, %100 : vector<4x1xi32>
    %103 = vector.broadcast %102 : vector<4x1xi32> to vector<4x16xi32>
    %104 = arith.cmpi eq, %8, %103 : vector<4x16xi32>
    %105 = arith.extui %104 : vector<4x16xi1> to vector<4x16xi32>
    %106 = arith.sitofp %105 : vector<4x16xi32> to vector<4x16xf32>
    %107 = arith.truncf %106 : vector<4x16xf32> to vector<4x16xbf16>
    %c0_17 = arith.constant 0 : index
    %108 = memref.load %arg1[%c0_17] : memref<8xi32, #tpu.memory_space<smem>>
    %c1_i32 = arith.constant 1 : i32
    %109 = arith.cmpi eq, %108, %c1_i32 : i32
    %110 = arith.select %109, %17, %107 : vector<4x16xbf16>
    %cst_18 = arith.constant dense<0xFF800000> : vector<4xf32>
    %111 = vector.multi_reduction <maximumf>, %87, %cst_18 [1] : vector<4x16xf32> to vector<4xf32>
    %112 = vector.shape_cast %111 : vector<4xf32> to vector<4x1xf32>
    %113 = vector.broadcast %112 : vector<4x1xf32> to vector<4x16xf32>
    %114 = arith.subf %87, %113 : vector<4x16xf32>
    %115 = math.exp %114 : vector<4x16xf32>
    %cst_19 = arith.constant dense<0.000000e+00> : vector<4xf32>
    %116 = vector.multi_reduction <add>, %115, %cst_19 [1] : vector<4x16xf32> to vector<4xf32>
    %117 = vector.shape_cast %116 : vector<4xf32> to vector<4x1xf32>
    %118 = math.log %117 : vector<4x1xf32>
    %119 = vector.broadcast %112 : vector<4x1xf32> to vector<4x16xf32>
    %120 = arith.subf %87, %119 : vector<4x16xf32>
    %121 = vector.broadcast %118 : vector<4x1xf32> to vector<4x16xf32>
    %122 = arith.subf %120, %121 : vector<4x16xf32>
    %c0_20 = arith.constant 0 : index
    %c0_21 = arith.constant 0 : index
    %123 = vector.load %arg5[%c0_20, %c0_21] : memref<4x160xf32, #tpu.memory_space<vmem>>, vector<4x16xf32>
    tpu.vector_store %arg5[%c0_20, %c0_21], %122 {strides = array<i32>} : memref<4x160xf32, #tpu.memory_space<vmem>>, vector<4x16xf32>,
    %cst_22 = arith.constant dense<0.000000e+00> : vector<4x128xf32>
    %124 = tpu.matmul %110, %0, %cst_22 {dimension_numbers = #tpu.dot_dimension_numbers<[1], [0], [0], [1], [0, 0, 1, 1], [], []>} : vector<4x16xbf16>, vector<16x128xbf16>, vector<4x128xf32> -> vector<4x128xf32>
    %cst_23 = arith.constant dense<0.000000e+00> : vector<4x128xf32>
    %125 = tpu.matmul %85, %1, %cst_23 {dimension_numbers = #tpu.dot_dimension_numbers<[1], [0], [0], [1], [0, 0, 1, 1], [], []>} : vector<4x32xbf16>, vector<32x128xbf16>, vector<4x128xf32> -> vector<4x128xf32>
    %126 = arith.addf %124, %125 : vector<4x128xf32>
    %127 = vector.extract_strided_slice %126 {offsets = [0, 0], sizes = [4, 32], strides = [1, 1]} : vector<4x128xf32> to vector<4x32xf32>
    %128 = arith.negf %127 : vector<4x32xf32>
    %129 = math.exp %128 : vector<4x32xf32>
    %cst_24 = arith.constant 1.000000e+00 : f32
    %130 = vector.broadcast %cst_24 : f32 to vector<4x32xf32>
    %131 = arith.addf %130, %129 : vector<4x32xf32>
    %132 = arith.divf %130, %131 : vector<4x32xf32>
    %133 = vector.extract_strided_slice %126 {offsets = [0, 32], sizes = [4, 32], strides = [1, 1]} : vector<4x128xf32> to vector<4x32xf32>
    %134 = arith.negf %133 : vector<4x32xf32>
    %135 = math.exp %134 : vector<4x32xf32>
    %cst_25 = arith.constant 1.000000e+00 : f32
    %136 = vector.broadcast %cst_25 : f32 to vector<4x32xf32>
    %137 = arith.addf %136, %135 : vector<4x32xf32>
    %138 = arith.divf %136, %137 : vector<4x32xf32>
    %139 = vector.extract_strided_slice %126 {offsets = [0, 64], sizes = [4, 32], strides = [1, 1]} : vector<4x128xf32> to vector<4x32xf32>
    %140 = vector.extract_strided_slice %126 {offsets = [0, 96], sizes = [4, 32], strides = [1, 1]} : vector<4x128xf32> to vector<4x32xf32>
    %141 = arith.mulf %132, %140 : vector<4x32xf32>
    %142 = arith.addf %139, %141 : vector<4x32xf32>
    %143 = math.tanh %142 : vector<4x32xf32>
    %cst_26 = arith.constant 1.000000e+00 : f32
    %144 = vector.broadcast %cst_26 : f32 to vector<4x32xf32>
    %145 = arith.subf %144, %138 : vector<4x32xf32>
    %146 = arith.mulf %145, %143 : vector<4x32xf32>
    %147 = arith.mulf %138, %84 : vector<4x32xf32>
    %148 = arith.addf %146, %147 : vector<4x32xf32>
    %149 = arith.truncf %148 : vector<4x32xf32> to vector<4x32xbf16>
    %cst_27 = arith.constant dense<0.000000e+00> : vector<4x16xf32>
    %150 = tpu.matmul %149, %2, %cst_27 {dimension_numbers = #tpu.dot_dimension_numbers<[1], [0], [0], [1], [0, 0, 1, 1], [], []>} : vector<4x32xbf16>, vector<32x16xbf16>, vector<4x16xf32> -> vector<4x16xf32>
    %151 = arith.addf %150, %6 : vector<4x16xf32>
    %152 = tpu.bitcast %151 : vector<4x16xf32> -> vector<4x16xi32>
    %c0_i32_28 = arith.constant 0 : i32
    %153 = vector.broadcast %c0_i32_28 : i32 to vector<4x16xi32>
    %154 = arith.cmpi slt, %152, %153 : vector<4x16xi32>
    %c2147483647_i32_29 = arith.constant 2147483647 : i32
    %155 = vector.broadcast %c2147483647_i32_29 : i32 to vector<4x16xi32>
    %156 = arith.xori %152, %155 : vector<4x16xi32>
    %157 = arith.select %154, %156, %152 : vector<4x16xi1>, vector<4x16xi32>
    %158 = vector.broadcast %11 : i32 to vector<4x16xi32>
    %159 = arith.andi %157, %158 : vector<4x16xi32>
    %160 = arith.ori %159, %10 : vector<4x16xi32>
    %cst_30 = arith.constant dense<-2147483648> : vector<4xi32>
    %161 = vector.multi_reduction <maxsi>, %160, %cst_30 [1] : vector<4x16xi32> to vector<4xi32>
    %162 = vector.shape_cast %161 : vector<4xi32> to vector<4x1xi32>
    %c15_i32_31 = arith.constant 15 : i32
    %163 = vector.broadcast %c15_i32_31 : i32 to vector<4x1xi32>
    %164 = arith.andi %162, %163 : vector<4x1xi32>
    %c15_i32_32 = arith.constant 15 : i32
    %165 = vector.broadcast %c15_i32_32 : i32 to vector<4x1xi32>
    %166 = arith.subi %165, %164 : vector<4x1xi32>
    %167 = vector.broadcast %166 : vector<4x1xi32> to vector<4x16xi32>
    %168 = arith.cmpi eq, %8, %167 : vector<4x16xi32>
    %169 = arith.extui %168 : vector<4x16xi1> to vector<4x16xi32>
    %170 = arith.sitofp %169 : vector<4x16xi32> to vector<4x16xf32>
    %171 = arith.truncf %170 : vector<4x16xf32> to vector<4x16xbf16>
    %c1 = arith.constant 1 : index
    %172 = memref.load %arg1[%c1] : memref<8xi32, #tpu.memory_space<smem>>
    %c1_i32_33 = arith.constant 1 : i32
    %173 = arith.cmpi eq, %172, %c1_i32_33 : i32
    %174 = arith.select %173, %23, %171 : vector<4x16xbf16>
    %cst_34 = arith.constant dense<0xFF800000> : vector<4xf32>
    %175 = vector.multi_reduction <maximumf>, %151, %cst_34 [1] : vector<4x16xf32> to vector<4xf32>
    %176 = vector.shape_cast %175 : vector<4xf32> to vector<4x1xf32>
    %177 = vector.broadcast %176 : vector<4x1xf32> to vector<4x16xf32>
    %178 = arith.subf %151, %177 : vector<4x16xf32>
    %179 = math.exp %178 : vector<4x16xf32>
    %cst_35 = arith.constant dense<0.000000e+00> : vector<4xf32>
    %180 = vector.multi_reduction <add>, %179, %cst_35 [1] : vector<4x16xf32> to vector<4xf32>
    %181 = vector.shape_cast %180 : vector<4xf32> to vector<4x1xf32>
    %182 = math.log %181 : vector<4x1xf32>
    %183 = vector.broadcast %176 : vector<4x1xf32> to vector<4x16xf32>
    %184 = arith.subf %151, %183 : vector<4x16xf32>
    %185 = vector.broadcast %182 : vector<4x1xf32> to vector<4x16xf32>
    %186 = arith.subf %184, %185 : vector<4x16xf32>
    %c0_36 = arith.constant 0 : index
    %c16_37 = arith.constant 16 : index
    %187 = vector.load %arg5[%c0_36, %c16_37] : memref<4x160xf32, #tpu.memory_space<vmem>>, vector<4x16xf32>
    tpu.vector_store %arg5[%c0_36, %c16_37], %186 {strides = array<i32>} : memref<4x160xf32, #tpu.memory_space<vmem>>, vector<4x16xf32>,
    %cst_38 = arith.constant dense<0.000000e+00> : vector<4x128xf32>
    %188 = tpu.matmul %174, %0, %cst_38 {dimension_numbers = #tpu.dot_dimension_numbers<[1], [0], [0], [1], [0, 0, 1, 1], [], []>} : vector<4x16xbf16>, vector<16x128xbf16>, vector<4x128xf32> -> vector<4x128xf32>
    %cst_39 = arith.constant dense<0.000000e+00> : vector<4x128xf32>
    %189 = tpu.matmul %149, %1, %cst_39 {dimension_numbers = #tpu.dot_dimension_numbers<[1], [0], [0], [1], [0, 0, 1, 1], [], []>} : vector<4x32xbf16>, vector<32x128xbf16>, vector<4x128xf32> -> vector<4x128xf32>
    %190 = arith.addf %188, %189 : vector<4x128xf32>
    %191 = vector.extract_strided_slice %190 {offsets = [0, 0], sizes = [4, 32], strides = [1, 1]} : vector<4x128xf32> to vector<4x32xf32>
    %192 = arith.negf %191 : vector<4x32xf32>
    %193 = math.exp %192 : vector<4x32xf32>
    %cst_40 = arith.constant 1.000000e+00 : f32
    %194 = vector.broadcast %cst_40 : f32 to vector<4x32xf32>
    %195 = arith.addf %194, %193 : vector<4x32xf32>
    %196 = arith.divf %194, %195 : vector<4x32xf32>
    %197 = vector.extract_strided_slice %190 {offsets = [0, 32], sizes = [4, 32], strides = [1, 1]} : vector<4x128xf32> to vector<4x32xf32>
    %198 = arith.negf %197 : vector<4x32xf32>
    %199 = math.exp %198 : vector<4x32xf32>
    %cst_41 = arith.constant 1.000000e+00 : f32
    %200 = vector.broadcast %cst_41 : f32 to vector<4x32xf32>
    %201 = arith.addf %200, %199 : vector<4x32xf32>
    %202 = arith.divf %200, %201 : vector<4x32xf32>
    %203 = vector.extract_strided_slice %190 {offsets = [0, 64], sizes = [4, 32], strides = [1, 1]} : vector<4x128xf32> to vector<4x32xf32>
    %204 = vector.extract_strided_slice %190 {offsets = [0, 96], sizes = [4, 32], strides = [1, 1]} : vector<4x128xf32> to vector<4x32xf32>
    %205 = arith.mulf %196, %204 : vector<4x32xf32>
    %206 = arith.addf %203, %205 : vector<4x32xf32>
    %207 = math.tanh %206 : vector<4x32xf32>
    %cst_42 = arith.constant 1.000000e+00 : f32
    %208 = vector.broadcast %cst_42 : f32 to vector<4x32xf32>
    %209 = arith.subf %208, %202 : vector<4x32xf32>
    %210 = arith.mulf %209, %207 : vector<4x32xf32>
    %211 = arith.mulf %202, %148 : vector<4x32xf32>
    %212 = arith.addf %210, %211 : vector<4x32xf32>
    %213 = arith.truncf %212 : vector<4x32xf32> to vector<4x32xbf16>
    %cst_43 = arith.constant dense<0.000000e+00> : vector<4x16xf32>
    %214 = tpu.matmul %213, %2, %cst_43 {dimension_numbers = #tpu.dot_dimension_numbers<[1], [0], [0], [1], [0, 0, 1, 1], [], []>} : vector<4x32xbf16>, vector<32x16xbf16>, vector<4x16xf32> -> vector<4x16xf32>
    %215 = arith.addf %214, %6 : vector<4x16xf32>
    %216 = tpu.bitcast %215 : vector<4x16xf32> -> vector<4x16xi32>
    %c0_i32_44 = arith.constant 0 : i32
    %217 = vector.broadcast %c0_i32_44 : i32 to vector<4x16xi32>
    %218 = arith.cmpi slt, %216, %217 : vector<4x16xi32>
    %c2147483647_i32_45 = arith.constant 2147483647 : i32
    %219 = vector.broadcast %c2147483647_i32_45 : i32 to vector<4x16xi32>
    %220 = arith.xori %216, %219 : vector<4x16xi32>
    %221 = arith.select %218, %220, %216 : vector<4x16xi1>, vector<4x16xi32>
    %222 = vector.broadcast %11 : i32 to vector<4x16xi32>
    %223 = arith.andi %221, %222 : vector<4x16xi32>
    %224 = arith.ori %223, %10 : vector<4x16xi32>
    %cst_46 = arith.constant dense<-2147483648> : vector<4xi32>
    %225 = vector.multi_reduction <maxsi>, %224, %cst_46 [1] : vector<4x16xi32> to vector<4xi32>
    %226 = vector.shape_cast %225 : vector<4xi32> to vector<4x1xi32>
    %c15_i32_47 = arith.constant 15 : i32
    %227 = vector.broadcast %c15_i32_47 : i32 to vector<4x1xi32>
    %228 = arith.andi %226, %227 : vector<4x1xi32>
    %c15_i32_48 = arith.constant 15 : i32
    %229 = vector.broadcast %c15_i32_48 : i32 to vector<4x1xi32>
    %230 = arith.subi %229, %228 : vector<4x1xi32>
    %231 = vector.broadcast %230 : vector<4x1xi32> to vector<4x16xi32>
    %232 = arith.cmpi eq, %8, %231 : vector<4x16xi32>
    %233 = arith.extui %232 : vector<4x16xi1> to vector<4x16xi32>
    %234 = arith.sitofp %233 : vector<4x16xi32> to vector<4x16xf32>
    %235 = arith.truncf %234 : vector<4x16xf32> to vector<4x16xbf16>
    %c2 = arith.constant 2 : index
    %236 = memref.load %arg1[%c2] : memref<8xi32, #tpu.memory_space<smem>>
    %c1_i32_49 = arith.constant 1 : i32
    %237 = arith.cmpi eq, %236, %c1_i32_49 : i32
    %238 = arith.select %237, %29, %235 : vector<4x16xbf16>
    %cst_50 = arith.constant dense<0xFF800000> : vector<4xf32>
    %239 = vector.multi_reduction <maximumf>, %215, %cst_50 [1] : vector<4x16xf32> to vector<4xf32>
    %240 = vector.shape_cast %239 : vector<4xf32> to vector<4x1xf32>
    %241 = vector.broadcast %240 : vector<4x1xf32> to vector<4x16xf32>
    %242 = arith.subf %215, %241 : vector<4x16xf32>
    %243 = math.exp %242 : vector<4x16xf32>
    %cst_51 = arith.constant dense<0.000000e+00> : vector<4xf32>
    %244 = vector.multi_reduction <add>, %243, %cst_51 [1] : vector<4x16xf32> to vector<4xf32>
    %245 = vector.shape_cast %244 : vector<4xf32> to vector<4x1xf32>
    %246 = math.log %245 : vector<4x1xf32>
    %247 = vector.broadcast %240 : vector<4x1xf32> to vector<4x16xf32>
    %248 = arith.subf %215, %247 : vector<4x16xf32>
    %249 = vector.broadcast %246 : vector<4x1xf32> to vector<4x16xf32>
    %250 = arith.subf %248, %249 : vector<4x16xf32>
    %c0_52 = arith.constant 0 : index
    %c32 = arith.constant 32 : index
    %251 = vector.load %arg5[%c0_52, %c32] : memref<4x160xf32, #tpu.memory_space<vmem>>, vector<4x16xf32>
    tpu.vector_store %arg5[%c0_52, %c32], %250 {strides = array<i32>} : memref<4x160xf32, #tpu.memory_space<vmem>>, vector<4x16xf32>,
    %cst_53 = arith.constant dense<0.000000e+00> : vector<4x128xf32>
    %252 = tpu.matmul %238, %0, %cst_53 {dimension_numbers = #tpu.dot_dimension_numbers<[1], [0], [0], [1], [0, 0, 1, 1], [], []>} : vector<4x16xbf16>, vector<16x128xbf16>, vector<4x128xf32> -> vector<4x128xf32>
    %cst_54 = arith.constant dense<0.000000e+00> : vector<4x128xf32>
    %253 = tpu.matmul %213, %1, %cst_54 {dimension_numbers = #tpu.dot_dimension_numbers<[1], [0], [0], [1], [0, 0, 1, 1], [], []>} : vector<4x32xbf16>, vector<32x128xbf16>, vector<4x128xf32> -> vector<4x128xf32>
    %254 = arith.addf %252, %253 : vector<4x128xf32>
    %255 = vector.extract_strided_slice %254 {offsets = [0, 0], sizes = [4, 32], strides = [1, 1]} : vector<4x128xf32> to vector<4x32xf32>
    %256 = arith.negf %255 : vector<4x32xf32>
    %257 = math.exp %256 : vector<4x32xf32>
    %cst_55 = arith.constant 1.000000e+00 : f32
    %258 = vector.broadcast %cst_55 : f32 to vector<4x32xf32>
    %259 = arith.addf %258, %257 : vector<4x32xf32>
    %260 = arith.divf %258, %259 : vector<4x32xf32>
    %261 = vector.extract_strided_slice %254 {offsets = [0, 32], sizes = [4, 32], strides = [1, 1]} : vector<4x128xf32> to vector<4x32xf32>
    %262 = arith.negf %261 : vector<4x32xf32>
    %263 = math.exp %262 : vector<4x32xf32>
    %cst_56 = arith.constant 1.000000e+00 : f32
    %264 = vector.broadcast %cst_56 : f32 to vector<4x32xf32>
    %265 = arith.addf %264, %263 : vector<4x32xf32>
    %266 = arith.divf %264, %265 : vector<4x32xf32>
    %267 = vector.extract_strided_slice %254 {offsets = [0, 64], sizes = [4, 32], strides = [1, 1]} : vector<4x128xf32> to vector<4x32xf32>
    %268 = vector.extract_strided_slice %254 {offsets = [0, 96], sizes = [4, 32], strides = [1, 1]} : vector<4x128xf32> to vector<4x32xf32>
    %269 = arith.mulf %260, %268 : vector<4x32xf32>
    %270 = arith.addf %267, %269 : vector<4x32xf32>
    %271 = math.tanh %270 : vector<4x32xf32>
    %cst_57 = arith.constant 1.000000e+00 : f32
    %272 = vector.broadcast %cst_57 : f32 to vector<4x32xf32>
    %273 = arith.subf %272, %266 : vector<4x32xf32>
    %274 = arith.mulf %273, %271 : vector<4x32xf32>
    %275 = arith.mulf %266, %212 : vector<4x32xf32>
    %276 = arith.addf %274, %275 : vector<4x32xf32>
    %277 = arith.truncf %276 : vector<4x32xf32> to vector<4x32xbf16>
    %cst_58 = arith.constant dense<0.000000e+00> : vector<4x16xf32>
    %278 = tpu.matmul %277, %2, %cst_58 {dimension_numbers = #tpu.dot_dimension_numbers<[1], [0], [0], [1], [0, 0, 1, 1], [], []>} : vector<4x32xbf16>, vector<32x16xbf16>, vector<4x16xf32> -> vector<4x16xf32>
    %279 = arith.addf %278, %6 : vector<4x16xf32>
    %280 = tpu.bitcast %279 : vector<4x16xf32> -> vector<4x16xi32>
    %c0_i32_59 = arith.constant 0 : i32
    %281 = vector.broadcast %c0_i32_59 : i32 to vector<4x16xi32>
    %282 = arith.cmpi slt, %280, %281 : vector<4x16xi32>
    %c2147483647_i32_60 = arith.constant 2147483647 : i32
    %283 = vector.broadcast %c2147483647_i32_60 : i32 to vector<4x16xi32>
    %284 = arith.xori %280, %283 : vector<4x16xi32>
    %285 = arith.select %282, %284, %280 : vector<4x16xi1>, vector<4x16xi32>
    %286 = vector.broadcast %11 : i32 to vector<4x16xi32>
    %287 = arith.andi %285, %286 : vector<4x16xi32>
    %288 = arith.ori %287, %10 : vector<4x16xi32>
    %cst_61 = arith.constant dense<-2147483648> : vector<4xi32>
    %289 = vector.multi_reduction <maxsi>, %288, %cst_61 [1] : vector<4x16xi32> to vector<4xi32>
    %290 = vector.shape_cast %289 : vector<4xi32> to vector<4x1xi32>
    %c15_i32_62 = arith.constant 15 : i32
    %291 = vector.broadcast %c15_i32_62 : i32 to vector<4x1xi32>
    %292 = arith.andi %290, %291 : vector<4x1xi32>
    %c15_i32_63 = arith.constant 15 : i32
    %293 = vector.broadcast %c15_i32_63 : i32 to vector<4x1xi32>
    %294 = arith.subi %293, %292 : vector<4x1xi32>
    %295 = vector.broadcast %294 : vector<4x1xi32> to vector<4x16xi32>
    %296 = arith.cmpi eq, %8, %295 : vector<4x16xi32>
    %297 = arith.extui %296 : vector<4x16xi1> to vector<4x16xi32>
    %298 = arith.sitofp %297 : vector<4x16xi32> to vector<4x16xf32>
    %299 = arith.truncf %298 : vector<4x16xf32> to vector<4x16xbf16>
    %c3 = arith.constant 3 : index
    %300 = memref.load %arg1[%c3] : memref<8xi32, #tpu.memory_space<smem>>
    %c1_i32_64 = arith.constant 1 : i32
    %301 = arith.cmpi eq, %300, %c1_i32_64 : i32
    %302 = arith.select %301, %35, %299 : vector<4x16xbf16>
    %cst_65 = arith.constant dense<0xFF800000> : vector<4xf32>
    %303 = vector.multi_reduction <maximumf>, %279, %cst_65 [1] : vector<4x16xf32> to vector<4xf32>
    %304 = vector.shape_cast %303 : vector<4xf32> to vector<4x1xf32>
    %305 = vector.broadcast %304 : vector<4x1xf32> to vector<4x16xf32>
    %306 = arith.subf %279, %305 : vector<4x16xf32>
    %307 = math.exp %306 : vector<4x16xf32>
    %cst_66 = arith.constant dense<0.000000e+00> : vector<4xf32>
    %308 = vector.multi_reduction <add>, %307, %cst_66 [1] : vector<4x16xf32> to vector<4xf32>
    %309 = vector.shape_cast %308 : vector<4xf32> to vector<4x1xf32>
    %310 = math.log %309 : vector<4x1xf32>
    %311 = vector.broadcast %304 : vector<4x1xf32> to vector<4x16xf32>
    %312 = arith.subf %279, %311 : vector<4x16xf32>
    %313 = vector.broadcast %310 : vector<4x1xf32> to vector<4x16xf32>
    %314 = arith.subf %312, %313 : vector<4x16xf32>
    %c0_67 = arith.constant 0 : index
    %c48_68 = arith.constant 48 : index
    %315 = vector.load %arg5[%c0_67, %c48_68] : memref<4x160xf32, #tpu.memory_space<vmem>>, vector<4x16xf32>
    tpu.vector_store %arg5[%c0_67, %c48_68], %314 {strides = array<i32>} : memref<4x160xf32, #tpu.memory_space<vmem>>, vector<4x16xf32>,
    %cst_69 = arith.constant dense<0.000000e+00> : vector<4x128xf32>
    %316 = tpu.matmul %302, %0, %cst_69 {dimension_numbers = #tpu.dot_dimension_numbers<[1], [0], [0], [1], [0, 0, 1, 1], [], []>} : vector<4x16xbf16>, vector<16x128xbf16>, vector<4x128xf32> -> vector<4x128xf32>
    %cst_70 = arith.constant dense<0.000000e+00> : vector<4x128xf32>
    %317 = tpu.matmul %277, %1, %cst_70 {dimension_numbers = #tpu.dot_dimension_numbers<[1], [0], [0], [1], [0, 0, 1, 1], [], []>} : vector<4x32xbf16>, vector<32x128xbf16>, vector<4x128xf32> -> vector<4x128xf32>
    %318 = arith.addf %316, %317 : vector<4x128xf32>
    %319 = vector.extract_strided_slice %318 {offsets = [0, 0], sizes = [4, 32], strides = [1, 1]} : vector<4x128xf32> to vector<4x32xf32>
    %320 = arith.negf %319 : vector<4x32xf32>
    %321 = math.exp %320 : vector<4x32xf32>
    %cst_71 = arith.constant 1.000000e+00 : f32
    %322 = vector.broadcast %cst_71 : f32 to vector<4x32xf32>
    %323 = arith.addf %322, %321 : vector<4x32xf32>
    %324 = arith.divf %322, %323 : vector<4x32xf32>
    %325 = vector.extract_strided_slice %318 {offsets = [0, 32], sizes = [4, 32], strides = [1, 1]} : vector<4x128xf32> to vector<4x32xf32>
    %326 = arith.negf %325 : vector<4x32xf32>
    %327 = math.exp %326 : vector<4x32xf32>
    %cst_72 = arith.constant 1.000000e+00 : f32
    %328 = vector.broadcast %cst_72 : f32 to vector<4x32xf32>
    %329 = arith.addf %328, %327 : vector<4x32xf32>
    %330 = arith.divf %328, %329 : vector<4x32xf32>
    %331 = vector.extract_strided_slice %318 {offsets = [0, 64], sizes = [4, 32], strides = [1, 1]} : vector<4x128xf32> to vector<4x32xf32>
    %332 = vector.extract_strided_slice %318 {offsets = [0, 96], sizes = [4, 32], strides = [1, 1]} : vector<4x128xf32> to vector<4x32xf32>
    %333 = arith.mulf %324, %332 : vector<4x32xf32>
    %334 = arith.addf %331, %333 : vector<4x32xf32>
    %335 = math.tanh %334 : vector<4x32xf32>
    %cst_73 = arith.constant 1.000000e+00 : f32
    %336 = vector.broadcast %cst_73 : f32 to vector<4x32xf32>
    %337 = arith.subf %336, %330 : vector<4x32xf32>
    %338 = arith.mulf %337, %335 : vector<4x32xf32>
    %339 = arith.mulf %330, %276 : vector<4x32xf32>
    %340 = arith.addf %338, %339 : vector<4x32xf32>
    %341 = arith.truncf %340 : vector<4x32xf32> to vector<4x32xbf16>
    %cst_74 = arith.constant dense<0.000000e+00> : vector<4x16xf32>
    %342 = tpu.matmul %341, %2, %cst_74 {dimension_numbers = #tpu.dot_dimension_numbers<[1], [0], [0], [1], [0, 0, 1, 1], [], []>} : vector<4x32xbf16>, vector<32x16xbf16>, vector<4x16xf32> -> vector<4x16xf32>
    %343 = arith.addf %342, %6 : vector<4x16xf32>
    %344 = tpu.bitcast %343 : vector<4x16xf32> -> vector<4x16xi32>
    %c0_i32_75 = arith.constant 0 : i32
    %345 = vector.broadcast %c0_i32_75 : i32 to vector<4x16xi32>
    %346 = arith.cmpi slt, %344, %345 : vector<4x16xi32>
    %c2147483647_i32_76 = arith.constant 2147483647 : i32
    %347 = vector.broadcast %c2147483647_i32_76 : i32 to vector<4x16xi32>
    %348 = arith.xori %344, %347 : vector<4x16xi32>
    %349 = arith.select %346, %348, %344 : vector<4x16xi1>, vector<4x16xi32>
    %350 = vector.broadcast %11 : i32 to vector<4x16xi32>
    %351 = arith.andi %349, %350 : vector<4x16xi32>
    %352 = arith.ori %351, %10 : vector<4x16xi32>
    %cst_77 = arith.constant dense<-2147483648> : vector<4xi32>
    %353 = vector.multi_reduction <maxsi>, %352, %cst_77 [1] : vector<4x16xi32> to vector<4xi32>
    %354 = vector.shape_cast %353 : vector<4xi32> to vector<4x1xi32>
    %c15_i32_78 = arith.constant 15 : i32
    %355 = vector.broadcast %c15_i32_78 : i32 to vector<4x1xi32>
    %356 = arith.andi %354, %355 : vector<4x1xi32>
    %c15_i32_79 = arith.constant 15 : i32
    %357 = vector.broadcast %c15_i32_79 : i32 to vector<4x1xi32>
    %358 = arith.subi %357, %356 : vector<4x1xi32>
    %359 = vector.broadcast %358 : vector<4x1xi32> to vector<4x16xi32>
    %360 = arith.cmpi eq, %8, %359 : vector<4x16xi32>
    %361 = arith.extui %360 : vector<4x16xi1> to vector<4x16xi32>
    %362 = arith.sitofp %361 : vector<4x16xi32> to vector<4x16xf32>
    %363 = arith.truncf %362 : vector<4x16xf32> to vector<4x16xbf16>
    %c4_80 = arith.constant 4 : index
    %364 = memref.load %arg1[%c4_80] : memref<8xi32, #tpu.memory_space<smem>>
    %c1_i32_81 = arith.constant 1 : i32
    %365 = arith.cmpi eq, %364, %c1_i32_81 : i32
    %366 = arith.select %365, %41, %363 : vector<4x16xbf16>
    %cst_82 = arith.constant dense<0xFF800000> : vector<4xf32>
    %367 = vector.multi_reduction <maximumf>, %343, %cst_82 [1] : vector<4x16xf32> to vector<4xf32>
    %368 = vector.shape_cast %367 : vector<4xf32> to vector<4x1xf32>
    %369 = vector.broadcast %368 : vector<4x1xf32> to vector<4x16xf32>
    %370 = arith.subf %343, %369 : vector<4x16xf32>
    %371 = math.exp %370 : vector<4x16xf32>
    %cst_83 = arith.constant dense<0.000000e+00> : vector<4xf32>
    %372 = vector.multi_reduction <add>, %371, %cst_83 [1] : vector<4x16xf32> to vector<4xf32>
    %373 = vector.shape_cast %372 : vector<4xf32> to vector<4x1xf32>
    %374 = math.log %373 : vector<4x1xf32>
    %375 = vector.broadcast %368 : vector<4x1xf32> to vector<4x16xf32>
    %376 = arith.subf %343, %375 : vector<4x16xf32>
    %377 = vector.broadcast %374 : vector<4x1xf32> to vector<4x16xf32>
    %378 = arith.subf %376, %377 : vector<4x16xf32>
    %c0_84 = arith.constant 0 : index
    %c64 = arith.constant 64 : index
    %379 = vector.load %arg5[%c0_84, %c64] : memref<4x160xf32, #tpu.memory_space<vmem>>, vector<4x16xf32>
    tpu.vector_store %arg5[%c0_84, %c64], %378 {strides = array<i32>} : memref<4x160xf32, #tpu.memory_space<vmem>>, vector<4x16xf32>,
    %cst_85 = arith.constant dense<0.000000e+00> : vector<4x128xf32>
    %380 = tpu.matmul %366, %0, %cst_85 {dimension_numbers = #tpu.dot_dimension_numbers<[1], [0], [0], [1], [0, 0, 1, 1], [], []>} : vector<4x16xbf16>, vector<16x128xbf16>, vector<4x128xf32> -> vector<4x128xf32>
    %cst_86 = arith.constant dense<0.000000e+00> : vector<4x128xf32>
    %381 = tpu.matmul %341, %1, %cst_86 {dimension_numbers = #tpu.dot_dimension_numbers<[1], [0], [0], [1], [0, 0, 1, 1], [], []>} : vector<4x32xbf16>, vector<32x128xbf16>, vector<4x128xf32> -> vector<4x128xf32>
    %382 = arith.addf %380, %381 : vector<4x128xf32>
    %383 = vector.extract_strided_slice %382 {offsets = [0, 0], sizes = [4, 32], strides = [1, 1]} : vector<4x128xf32> to vector<4x32xf32>
    %384 = arith.negf %383 : vector<4x32xf32>
    %385 = math.exp %384 : vector<4x32xf32>
    %cst_87 = arith.constant 1.000000e+00 : f32
    %386 = vector.broadcast %cst_87 : f32 to vector<4x32xf32>
    %387 = arith.addf %386, %385 : vector<4x32xf32>
    %388 = arith.divf %386, %387 : vector<4x32xf32>
    %389 = vector.extract_strided_slice %382 {offsets = [0, 32], sizes = [4, 32], strides = [1, 1]} : vector<4x128xf32> to vector<4x32xf32>
    %390 = arith.negf %389 : vector<4x32xf32>
    %391 = math.exp %390 : vector<4x32xf32>
    %cst_88 = arith.constant 1.000000e+00 : f32
    %392 = vector.broadcast %cst_88 : f32 to vector<4x32xf32>
    %393 = arith.addf %392, %391 : vector<4x32xf32>
    %394 = arith.divf %392, %393 : vector<4x32xf32>
    %395 = vector.extract_strided_slice %382 {offsets = [0, 64], sizes = [4, 32], strides = [1, 1]} : vector<4x128xf32> to vector<4x32xf32>
    %396 = vector.extract_strided_slice %382 {offsets = [0, 96], sizes = [4, 32], strides = [1, 1]} : vector<4x128xf32> to vector<4x32xf32>
    %397 = arith.mulf %388, %396 : vector<4x32xf32>
    %398 = arith.addf %395, %397 : vector<4x32xf32>
    %399 = math.tanh %398 : vector<4x32xf32>
    %cst_89 = arith.constant 1.000000e+00 : f32
    %400 = vector.broadcast %cst_89 : f32 to vector<4x32xf32>
    %401 = arith.subf %400, %394 : vector<4x32xf32>
    %402 = arith.mulf %401, %399 : vector<4x32xf32>
    %403 = arith.mulf %394, %340 : vector<4x32xf32>
    %404 = arith.addf %402, %403 : vector<4x32xf32>
    %405 = arith.truncf %404 : vector<4x32xf32> to vector<4x32xbf16>
    %cst_90 = arith.constant dense<0.000000e+00> : vector<4x16xf32>
    %406 = tpu.matmul %405, %2, %cst_90 {dimension_numbers = #tpu.dot_dimension_numbers<[1], [0], [0], [1], [0, 0, 1, 1], [], []>} : vector<4x32xbf16>, vector<32x16xbf16>, vector<4x16xf32> -> vector<4x16xf32>
    %407 = arith.addf %406, %6 : vector<4x16xf32>
    %408 = tpu.bitcast %407 : vector<4x16xf32> -> vector<4x16xi32>
    %c0_i32_91 = arith.constant 0 : i32
    %409 = vector.broadcast %c0_i32_91 : i32 to vector<4x16xi32>
    %410 = arith.cmpi slt, %408, %409 : vector<4x16xi32>
    %c2147483647_i32_92 = arith.constant 2147483647 : i32
    %411 = vector.broadcast %c2147483647_i32_92 : i32 to vector<4x16xi32>
    %412 = arith.xori %408, %411 : vector<4x16xi32>
    %413 = arith.select %410, %412, %408 : vector<4x16xi1>, vector<4x16xi32>
    %414 = vector.broadcast %11 : i32 to vector<4x16xi32>
    %415 = arith.andi %413, %414 : vector<4x16xi32>
    %416 = arith.ori %415, %10 : vector<4x16xi32>
    %cst_93 = arith.constant dense<-2147483648> : vector<4xi32>
    %417 = vector.multi_reduction <maxsi>, %416, %cst_93 [1] : vector<4x16xi32> to vector<4xi32>
    %418 = vector.shape_cast %417 : vector<4xi32> to vector<4x1xi32>
    %c15_i32_94 = arith.constant 15 : i32
    %419 = vector.broadcast %c15_i32_94 : i32 to vector<4x1xi32>
    %420 = arith.andi %418, %419 : vector<4x1xi32>
    %c15_i32_95 = arith.constant 15 : i32
    %421 = vector.broadcast %c15_i32_95 : i32 to vector<4x1xi32>
    %422 = arith.subi %421, %420 : vector<4x1xi32>
    %423 = vector.broadcast %422 : vector<4x1xi32> to vector<4x16xi32>
    %424 = arith.cmpi eq, %8, %423 : vector<4x16xi32>
    %425 = arith.extui %424 : vector<4x16xi1> to vector<4x16xi32>
    %426 = arith.sitofp %425 : vector<4x16xi32> to vector<4x16xf32>
    %427 = arith.truncf %426 : vector<4x16xf32> to vector<4x16xbf16>
    %c5 = arith.constant 5 : index
    %428 = memref.load %arg1[%c5] : memref<8xi32, #tpu.memory_space<smem>>
    %c1_i32_96 = arith.constant 1 : i32
    %429 = arith.cmpi eq, %428, %c1_i32_96 : i32
    %430 = arith.select %429, %47, %427 : vector<4x16xbf16>
    %cst_97 = arith.constant dense<0xFF800000> : vector<4xf32>
    %431 = vector.multi_reduction <maximumf>, %407, %cst_97 [1] : vector<4x16xf32> to vector<4xf32>
    %432 = vector.shape_cast %431 : vector<4xf32> to vector<4x1xf32>
    %433 = vector.broadcast %432 : vector<4x1xf32> to vector<4x16xf32>
    %434 = arith.subf %407, %433 : vector<4x16xf32>
    %435 = math.exp %434 : vector<4x16xf32>
    %cst_98 = arith.constant dense<0.000000e+00> : vector<4xf32>
    %436 = vector.multi_reduction <add>, %435, %cst_98 [1] : vector<4x16xf32> to vector<4xf32>
    %437 = vector.shape_cast %436 : vector<4xf32> to vector<4x1xf32>
    %438 = math.log %437 : vector<4x1xf32>
    %439 = vector.broadcast %432 : vector<4x1xf32> to vector<4x16xf32>
    %440 = arith.subf %407, %439 : vector<4x16xf32>
    %441 = vector.broadcast %438 : vector<4x1xf32> to vector<4x16xf32>
    %442 = arith.subf %440, %441 : vector<4x16xf32>
    %c0_99 = arith.constant 0 : index
    %c80 = arith.constant 80 : index
    %443 = vector.load %arg5[%c0_99, %c80] : memref<4x160xf32, #tpu.memory_space<vmem>>, vector<4x16xf32>
    tpu.vector_store %arg5[%c0_99, %c80], %442 {strides = array<i32>} : memref<4x160xf32, #tpu.memory_space<vmem>>, vector<4x16xf32>,
    %cst_100 = arith.constant dense<0.000000e+00> : vector<4x128xf32>
    %444 = tpu.matmul %430, %0, %cst_100 {dimension_numbers = #tpu.dot_dimension_numbers<[1], [0], [0], [1], [0, 0, 1, 1], [], []>} : vector<4x16xbf16>, vector<16x128xbf16>, vector<4x128xf32> -> vector<4x128xf32>
    %cst_101 = arith.constant dense<0.000000e+00> : vector<4x128xf32>
    %445 = tpu.matmul %405, %1, %cst_101 {dimension_numbers = #tpu.dot_dimension_numbers<[1], [0], [0], [1], [0, 0, 1, 1], [], []>} : vector<4x32xbf16>, vector<32x128xbf16>, vector<4x128xf32> -> vector<4x128xf32>
    %446 = arith.addf %444, %445 : vector<4x128xf32>
    %447 = vector.extract_strided_slice %446 {offsets = [0, 0], sizes = [4, 32], strides = [1, 1]} : vector<4x128xf32> to vector<4x32xf32>
    %448 = arith.negf %447 : vector<4x32xf32>
    %449 = math.exp %448 : vector<4x32xf32>
    %cst_102 = arith.constant 1.000000e+00 : f32
    %450 = vector.broadcast %cst_102 : f32 to vector<4x32xf32>
    %451 = arith.addf %450, %449 : vector<4x32xf32>
    %452 = arith.divf %450, %451 : vector<4x32xf32>
    %453 = vector.extract_strided_slice %446 {offsets = [0, 32], sizes = [4, 32], strides = [1, 1]} : vector<4x128xf32> to vector<4x32xf32>
    %454 = arith.negf %453 : vector<4x32xf32>
    %455 = math.exp %454 : vector<4x32xf32>
    %cst_103 = arith.constant 1.000000e+00 : f32
    %456 = vector.broadcast %cst_103 : f32 to vector<4x32xf32>
    %457 = arith.addf %456, %455 : vector<4x32xf32>
    %458 = arith.divf %456, %457 : vector<4x32xf32>
    %459 = vector.extract_strided_slice %446 {offsets = [0, 64], sizes = [4, 32], strides = [1, 1]} : vector<4x128xf32> to vector<4x32xf32>
    %460 = vector.extract_strided_slice %446 {offsets = [0, 96], sizes = [4, 32], strides = [1, 1]} : vector<4x128xf32> to vector<4x32xf32>
    %461 = arith.mulf %452, %460 : vector<4x32xf32>
    %462 = arith.addf %459, %461 : vector<4x32xf32>
    %463 = math.tanh %462 : vector<4x32xf32>
    %cst_104 = arith.constant 1.000000e+00 : f32
    %464 = vector.broadcast %cst_104 : f32 to vector<4x32xf32>
    %465 = arith.subf %464, %458 : vector<4x32xf32>
    %466 = arith.mulf %465, %463 : vector<4x32xf32>
    %467 = arith.mulf %458, %404 : vector<4x32xf32>
    %468 = arith.addf %466, %467 : vector<4x32xf32>
    %469 = arith.truncf %468 : vector<4x32xf32> to vector<4x32xbf16>
    %cst_105 = arith.constant dense<0.000000e+00> : vector<4x16xf32>
    %470 = tpu.matmul %469, %2, %cst_105 {dimension_numbers = #tpu.dot_dimension_numbers<[1], [0], [0], [1], [0, 0, 1, 1], [], []>} : vector<4x32xbf16>, vector<32x16xbf16>, vector<4x16xf32> -> vector<4x16xf32>
    %471 = arith.addf %470, %6 : vector<4x16xf32>
    %472 = tpu.bitcast %471 : vector<4x16xf32> -> vector<4x16xi32>
    %c0_i32_106 = arith.constant 0 : i32
    %473 = vector.broadcast %c0_i32_106 : i32 to vector<4x16xi32>
    %474 = arith.cmpi slt, %472, %473 : vector<4x16xi32>
    %c2147483647_i32_107 = arith.constant 2147483647 : i32
    %475 = vector.broadcast %c2147483647_i32_107 : i32 to vector<4x16xi32>
    %476 = arith.xori %472, %475 : vector<4x16xi32>
    %477 = arith.select %474, %476, %472 : vector<4x16xi1>, vector<4x16xi32>
    %478 = vector.broadcast %11 : i32 to vector<4x16xi32>
    %479 = arith.andi %477, %478 : vector<4x16xi32>
    %480 = arith.ori %479, %10 : vector<4x16xi32>
    %cst_108 = arith.constant dense<-2147483648> : vector<4xi32>
    %481 = vector.multi_reduction <maxsi>, %480, %cst_108 [1] : vector<4x16xi32> to vector<4xi32>
    %482 = vector.shape_cast %481 : vector<4xi32> to vector<4x1xi32>
    %c15_i32_109 = arith.constant 15 : i32
    %483 = vector.broadcast %c15_i32_109 : i32 to vector<4x1xi32>
    %484 = arith.andi %482, %483 : vector<4x1xi32>
    %c15_i32_110 = arith.constant 15 : i32
    %485 = vector.broadcast %c15_i32_110 : i32 to vector<4x1xi32>
    %486 = arith.subi %485, %484 : vector<4x1xi32>
    %487 = vector.broadcast %486 : vector<4x1xi32> to vector<4x16xi32>
    %488 = arith.cmpi eq, %8, %487 : vector<4x16xi32>
    %489 = arith.extui %488 : vector<4x16xi1> to vector<4x16xi32>
    %490 = arith.sitofp %489 : vector<4x16xi32> to vector<4x16xf32>
    %491 = arith.truncf %490 : vector<4x16xf32> to vector<4x16xbf16>
    %c6 = arith.constant 6 : index
    %492 = memref.load %arg1[%c6] : memref<8xi32, #tpu.memory_space<smem>>
    %c1_i32_111 = arith.constant 1 : i32
    %493 = arith.cmpi eq, %492, %c1_i32_111 : i32
    %494 = arith.select %493, %53, %491 : vector<4x16xbf16>
    %cst_112 = arith.constant dense<0xFF800000> : vector<4xf32>
    %495 = vector.multi_reduction <maximumf>, %471, %cst_112 [1] : vector<4x16xf32> to vector<4xf32>
    %496 = vector.shape_cast %495 : vector<4xf32> to vector<4x1xf32>
    %497 = vector.broadcast %496 : vector<4x1xf32> to vector<4x16xf32>
    %498 = arith.subf %471, %497 : vector<4x16xf32>
    %499 = math.exp %498 : vector<4x16xf32>
    %cst_113 = arith.constant dense<0.000000e+00> : vector<4xf32>
    %500 = vector.multi_reduction <add>, %499, %cst_113 [1] : vector<4x16xf32> to vector<4xf32>
    %501 = vector.shape_cast %500 : vector<4xf32> to vector<4x1xf32>
    %502 = math.log %501 : vector<4x1xf32>
    %503 = vector.broadcast %496 : vector<4x1xf32> to vector<4x16xf32>
    %504 = arith.subf %471, %503 : vector<4x16xf32>
    %505 = vector.broadcast %502 : vector<4x1xf32> to vector<4x16xf32>
    %506 = arith.subf %504, %505 : vector<4x16xf32>
    %c0_114 = arith.constant 0 : index
    %c96 = arith.constant 96 : index
    %507 = vector.load %arg5[%c0_114, %c96] : memref<4x160xf32, #tpu.memory_space<vmem>>, vector<4x16xf32>
    tpu.vector_store %arg5[%c0_114, %c96], %506 {strides = array<i32>} : memref<4x160xf32, #tpu.memory_space<vmem>>, vector<4x16xf32>,
    %cst_115 = arith.constant dense<0.000000e+00> : vector<4x128xf32>
    %508 = tpu.matmul %494, %0, %cst_115 {dimension_numbers = #tpu.dot_dimension_numbers<[1], [0], [0], [1], [0, 0, 1, 1], [], []>} : vector<4x16xbf16>, vector<16x128xbf16>, vector<4x128xf32> -> vector<4x128xf32>
    %cst_116 = arith.constant dense<0.000000e+00> : vector<4x128xf32>
    %509 = tpu.matmul %469, %1, %cst_116 {dimension_numbers = #tpu.dot_dimension_numbers<[1], [0], [0], [1], [0, 0, 1, 1], [], []>} : vector<4x32xbf16>, vector<32x128xbf16>, vector<4x128xf32> -> vector<4x128xf32>
    %510 = arith.addf %508, %509 : vector<4x128xf32>
    %511 = vector.extract_strided_slice %510 {offsets = [0, 0], sizes = [4, 32], strides = [1, 1]} : vector<4x128xf32> to vector<4x32xf32>
    %512 = arith.negf %511 : vector<4x32xf32>
    %513 = math.exp %512 : vector<4x32xf32>
    %cst_117 = arith.constant 1.000000e+00 : f32
    %514 = vector.broadcast %cst_117 : f32 to vector<4x32xf32>
    %515 = arith.addf %514, %513 : vector<4x32xf32>
    %516 = arith.divf %514, %515 : vector<4x32xf32>
    %517 = vector.extract_strided_slice %510 {offsets = [0, 32], sizes = [4, 32], strides = [1, 1]} : vector<4x128xf32> to vector<4x32xf32>
    %518 = arith.negf %517 : vector<4x32xf32>
    %519 = math.exp %518 : vector<4x32xf32>
    %cst_118 = arith.constant 1.000000e+00 : f32
    %520 = vector.broadcast %cst_118 : f32 to vector<4x32xf32>
    %521 = arith.addf %520, %519 : vector<4x32xf32>
    %522 = arith.divf %520, %521 : vector<4x32xf32>
    %523 = vector.extract_strided_slice %510 {offsets = [0, 64], sizes = [4, 32], strides = [1, 1]} : vector<4x128xf32> to vector<4x32xf32>
    %524 = vector.extract_strided_slice %510 {offsets = [0, 96], sizes = [4, 32], strides = [1, 1]} : vector<4x128xf32> to vector<4x32xf32>
    %525 = arith.mulf %516, %524 : vector<4x32xf32>
    %526 = arith.addf %523, %525 : vector<4x32xf32>
    %527 = math.tanh %526 : vector<4x32xf32>
    %cst_119 = arith.constant 1.000000e+00 : f32
    %528 = vector.broadcast %cst_119 : f32 to vector<4x32xf32>
    %529 = arith.subf %528, %522 : vector<4x32xf32>
    %530 = arith.mulf %529, %527 : vector<4x32xf32>
    %531 = arith.mulf %522, %468 : vector<4x32xf32>
    %532 = arith.addf %530, %531 : vector<4x32xf32>
    %533 = arith.truncf %532 : vector<4x32xf32> to vector<4x32xbf16>
    %cst_120 = arith.constant dense<0.000000e+00> : vector<4x16xf32>
    %534 = tpu.matmul %533, %2, %cst_120 {dimension_numbers = #tpu.dot_dimension_numbers<[1], [0], [0], [1], [0, 0, 1, 1], [], []>} : vector<4x32xbf16>, vector<32x16xbf16>, vector<4x16xf32> -> vector<4x16xf32>
    %535 = arith.addf %534, %6 : vector<4x16xf32>
    %cst_121 = arith.constant dense<0xFF800000> : vector<4xf32>
    %536 = vector.multi_reduction <maximumf>, %535, %cst_121 [1] : vector<4x16xf32> to vector<4xf32>
    %537 = vector.shape_cast %536 : vector<4xf32> to vector<4x1xf32>
    %538 = vector.broadcast %537 : vector<4x1xf32> to vector<4x16xf32>
    %539 = arith.subf %535, %538 : vector<4x16xf32>
    %540 = math.exp %539 : vector<4x16xf32>
    %cst_122 = arith.constant dense<0.000000e+00> : vector<4xf32>
    %541 = vector.multi_reduction <add>, %540, %cst_122 [1] : vector<4x16xf32> to vector<4xf32>
    %542 = vector.shape_cast %541 : vector<4xf32> to vector<4x1xf32>
    %543 = math.log %542 : vector<4x1xf32>
    %544 = vector.broadcast %537 : vector<4x1xf32> to vector<4x16xf32>
    %545 = arith.subf %535, %544 : vector<4x16xf32>
    %546 = vector.broadcast %543 : vector<4x1xf32> to vector<4x16xf32>
    %547 = arith.subf %545, %546 : vector<4x16xf32>
    %c0_123 = arith.constant 0 : index
    %c112 = arith.constant 112 : index
    %548 = vector.load %arg5[%c0_123, %c112] : memref<4x160xf32, #tpu.memory_space<vmem>>, vector<4x16xf32>
    tpu.vector_store %arg5[%c0_123, %c112], %547 {strides = array<i32>} : memref<4x160xf32, #tpu.memory_space<vmem>>, vector<4x16xf32>,
    %c0_124 = arith.constant 0 : index
    %c128 = arith.constant 128 : index
    %549 = vector.load %arg5[%c0_124, %c128] : memref<4x160xf32, #tpu.memory_space<vmem>>, vector<4x32xf32>
    tpu.vector_store %arg5[%c0_124, %c128], %532 {strides = array<i32>} : memref<4x160xf32, #tpu.memory_space<vmem>>, vector<4x32xf32>,
    return
  }
  func.func @transform_0(%arg0: i32, %arg1: memref<8xi32, #tpu.memory_space<smem>>) -> (i32, i32) {
    %c0_i32 = arith.constant 0 : i32
    %c0_i32_0 = arith.constant 0 : i32
    %c0_i32_1 = arith.constant 0 : i32
    return %c0_i32, %c0_i32_0 : i32, i32
  }
  func.func @transform_1(%arg0: i32, %arg1: memref<8xi32, #tpu.memory_space<smem>>) -> (i32, i32) {
    %c0_i32 = arith.constant 0 : i32
    %c0_i32_0 = arith.constant 0 : i32
    %c0_i32_1 = arith.constant 0 : i32
    return %c0_i32, %c0_i32_0 : i32, i32
  }
  func.func @transform_2(%arg0: i32, %arg1: memref<8xi32, #tpu.memory_space<smem>>) -> (i32, i32) {
    %c0_i32 = arith.constant 0 : i32
    %c0_i32_0 = arith.constant 0 : i32
    %c0_i32_1 = arith.constant 0 : i32
    return %c0_i32, %c0_i32_0 : i32, i32
  }
  func.func @transform_3(%arg0: i32, %arg1: memref<8xi32, #tpu.memory_space<smem>>) -> (i32, i32) {
    %c0_i32 = arith.constant 0 : i32
    %c0_i32_0 = arith.constant 0 : i32
    %c0_i32_1 = arith.constant 0 : i32
    return %c0_i32, %c0_i32_0 : i32, i32
  }
}

</mosaic_0001>

<bundles_post_ra>
// kernel: num_decoder_forward.1
= control target key start
LH: loop header
LB: loop body
LE: loop exit
PB: predicated region body
PF: predicated region fallthrough
CT: control target
= control target key end

     0   :  { %s2704_s0 = inlined_call_operand.vmem [shape: s32[8], index: 0, kind: input, shape index: {}]   ;;  %s2705_s1 = inlined_call_operand.hbm [shape: bf16[80,128], index: 1, kind: input, shape index: {}]   ;;  %s2706_s2 = inlined_call_operand.vmem [shape: f32[5,32], index: 2, kind: input, shape index: {}]   ;;  %s2707_s3 = inlined_call_operand.vmem [shape: s32[4,8], index: 3, kind: input, shape index: {}]   ;;  %s2708_s4 = inlined_call_operand.vmem [shape: f32[4,160], index: 4, kind: output, shape index: {}]  }
   0x1   :  { %s9_s17 = sshll.u32 %s2704_s0, 4  ;;  %s10_s17 = int_to_ptr.vmem [resolvable:$true] %s9_s17 }
   0x2   :  { %s2188_s18 = scalar_lea.vmem %s10_s17, 16  ;;  %p2193_p1 = scmp.lt.s32.totalorder %s10_s17, %s10_s17 }
   0x3   :  { %p2189_p0 = scmp.ne.s32.totalorder %s10_s17, %s2188_s18  ;;  %p2194_p2 = scmp.lt.s32.totalorder %s2188_s18, %s2188_s18 }
   0x5   :  { %p2195_p3 = por %p2194_p2, %p2193_p1 }
   0x7   :  { %p2196_p4 = pnand %p2195_p3, %p2189_p0 }
   0x9   :  { %2199 = shalt.err (!%p2196_p4)  }
   0xa   :  { %s2224_s19 = smov [#allocation3]  }
   0xb   :  { %12 = dma.vmem_to_smem %s10_s17, 16, %s2224_s19, [#allocation2] }
   0xc   :  { %2220 = dma.done.wait [#allocation2], 16 }
   0xd   :  { %2221 = vsyncadd [#allocation2], 4294967280 }
   0xe   :  { %14 = sfence }
   0xf   :  { %15 = vsyncpa [#allocation5], 0  ;;  %s2225_s20 = smov [#allocation4]  }
  0x10   :  { %s21_s21 = sshll.u32 %s2225_s20, 4  ;;  %s22_s21 = int_to_ptr.vmem [resolvable:$true] %s21_s21 }
  0x11   :  { %s2208_s22 = scalar_lea.vmem %s22_s21, 640  ;;  %p2213_p6 = scmp.lt.s32.totalorder %s22_s21, %s22_s21 }
  0x12   :  { %p2209_p5 = scmp.ne.s32.totalorder %s22_s21, %s2208_s22  ;;  %p2214_p7 = scmp.lt.s32.totalorder %s2208_s22, %s2208_s22 }
  0x14   :  { %p2215_p8 = por %p2214_p7, %p2213_p6 }
  0x16   :  { %p2216_p9 = pnand %p2215_p8, %p2209_p5 }
  0x18   :  { %2219 = shalt.err (!%p2216_p9)
}
  0x19   :  { %s2226_s0 = smov 64   ;;  %s2227_s23 = smov 4  }
  0x1a   :  { %27 = dma.hbm_to_vmem [thread:$0]  %s2705_s1, 640, %s22_s21, [#allocation5], %s2226_s0, %s2226_s0, %s2227_s23  }
  0x1b   :  { %2222 = dma.done.wait [#allocation5], 640  }
  0x1c   :  { %2223 = vsyncadd [#allocation5], 4294966656  ;;  %v53_v0 = vlaneseq  ;;  %v2228_v1 = vmov 0.0   ;;  %vm2229_vm0 = vmmov 0   ;;  %v2286_v4 = vld [vmem:[#allocation4 + $0x10] sm:$0xff]   ;;  %v2288_v5 = vld [vmem:[#allocation4] sm:$0xff]  }
  0x1d   :  { %1894 = vmatprep.subr.bf16.mxu0 %v2228_v1  ;;  %1902 = vmatprep.subr.bf16.mxu1 %v2228_v1  ;;  %vm172_vm2 = vcmask 130048   ;;  %v2291_v7 = vld [vmem:[#allocation4 + $0x8] sm:$0xff]   ;;  %v46_v8 = vld [vmem:[%s2706_s2] sm:$0xf]  ;;  %vm122_vm3 = vcmask 261120   ;;  %s2230_s27 = smov 32  }
  0x1e   :  { %1904 = vmatprep.mubr.msk.bf16.mxu1 %vm2229_vm0, %v2228_v1  ;;  %v2280_v2 = vand.u32 127, %v53_v0  ;;  %1898 = vmatprep.mubr.msk.bf16.mxu0 %vm2229_vm0, %v2228_v1  ;;  %v105_v9 = vpack.c.bf16 %v46_v8, %v46_v8  ;;  %v2313_v27 = vld [vmem:[#allocation4 + $0x20] sm:$0xff]   ;;  %v2316_v29 = vld [vmem:[#allocation4 + $0x18] sm:$0xff]   ;;  %s2231_s28 = smov 96   ;;  %vm310_vm5 = vcmask 125952   ;;  %v2232_v56 = vmov 0  }
  0x1f   :  { %1895 = vmatpush3.bf16.msra.mxu0 %v2286_v4  ;;  %1903 = vmatpush3.bf16.msra.mxu1 %v2288_v5  ;;  %v2343_v38 = vld [vmem:[%s2706_s2 + $0x4] ss:$0 sm:$0xff]  ;;  %v2359_v61 = vld [vmem:[%s2707_s3] sm:$0xf]  ;;  %s332_s7 = sld [smem:[#allocation3]]  ;;  %s2239_s25 = smov 80  }
  0x20   :  { %vm106_vm1 = vcmp.eq.s32.totalorder %v2280_v2, 2  ;;  %1896 = vmatprep.subr.bf16.mxu0 %v2228_v1  ;;  %1908 = vmatprep.subr.bf16.mxu1 %v2228_v1  ;;  %v2351_v47 = vsub.s32 15, %v2280_v2  ;;  %s1795_s9 = sld [smem:[#allocation3 + $0x1]]  ;;  %s2240_s1 = smov 16  }
  0x21   :  { %v1779_v3 = vsel %vm106_vm1, 1.0, %v2228_v1  ;;  %2089 = vset.pattern.permute.xlu0 %v2232_v56  ;;  %s1801_s11 = sld [smem:[#allocation3 + $0x2]]  ;;  %s2241_s26 = smov 48  }
  0x22   :  { %v109_v6 = vpack.c.bf16 %v1779_v3, %v1779_v3  ;;  %s1807_s13 = sld [smem:[#allocation3 + $0x3]] }
  0x23   :  { %1897 = vmatpush3.bf16.msra.mxu0 %v2291_v7  ;;  %s1813_s15 = sld [smem:[#allocation3 + $0x4]] }
  0x24   :  { %1905 = vmatmul.mubr.msk.bf16.vlgmr.msra.gmra.mxu1 %vm172_vm2, %v109_v6  ;;  %1916 = vmatprep.subr.bf16.mxu0 %v2228_v1  ;;  %s1819_s17 = sld [smem:[#allocation3 + $0x5]] }
  0x25   :  { %1912 = vmatprep.mubr.msk.bf16.mxu1 %vm2229_vm0, %v2228_v1  ;;  %1909 = vmatpush3.bf16.msra.mxu1 %v2313_v27  ;;  %p333_p10 = scmp.eq.s32.totalorder %s332_s7, 1 }
  0x26   :  { %1899 = vmatmul.mubr.msk.bf16.vlgmr.msra.gmra.mxu0 %vm122_vm3, %v105_v9  ;;  %1910 = vmatprep.subr.bf16.mxu1 %v2228_v1  ;;  %p534_p11 = scmp.eq.s32.totalorder %s1795_s9, 1 }
  0x27   :  { %1917 = vmatpush3.bf16.msra.mxu0 %v2286_v4  ;;  %1920 = vmatprep.mubr.msk.bf16.mxu0 %vm2229_vm0, %v2228_v1  ;;  %s334_s8 = scalar_select %p333_p10, 1, 0 }
  0x28   :  { %1918 = vmatprep.subr.bf16.mxu0 %v2228_v1  ;;  %s535_s10 = scalar_select %p534_p11, 1, 0 }
  0x29   :  { %1911 = vmatpush3.bf16.msra.mxu1 %v2316_v29  ;;  %p740_p12 = scmp.eq.s32.totalorder %s1801_s11, 1  ;;  %p946_p13 = scmp.eq.s32.totalorder %s1807_s13, 1 }
  0x2a   :  { %1924 = vmatprep.subr.bf16.mxu1 %v2228_v1  ;;  %p1152_p0 = scmp.eq.s32.totalorder %s1813_s15, 1  ;;  %p1358_p1 = scmp.eq.s32.totalorder %s1819_s17, 1 }
  0x2b   :  { %1919 = vmatpush3.bf16.msra.mxu0 %v2291_v7  ;;  %s741_s12 = scalar_select %p740_p12, 1, 0 }
  0x2c   :  { %1930 = vmatprep.subr.bf16.mxu0 %v2228_v1  ;;  %s947_s14 = scalar_select %p946_p13, 1, 0 }
  0x2d   :  { %s1153_s16 = scalar_select %p1152_p0, 1, 0 }
  0x2e   :  { %s1359_s18 = scalar_select %p1358_p1, 1, 0 }
  0xe4   :  { %v210_v10 = vpop.f32.mrf.mxu1 }
  0xe6   :  { %v1906_v11 = vpop.f32.mrf.mxu1  ;;  %v160_v12 = vpop.f32.mrf.mxu0 }
  0xe7   :  { %v211_v13 = vadd.f32 %v210_v10, %v160_v12  ;;  %v335_v10 = vstv %s334_s8 }
  0xe8   :  { %v213_v14 = vpop.f32.mrf.mxu1  ;;  %v1900_v15 = vpop.f32.mrf.mxu0  ;;  %vm336_vm9 = vcmp.eq.s32.totalorder %v335_v10, 1 }
  0xe9   :  { %223 = vrot.lane.b32.xlu0 %v211_v13, %s2230_s27  ;;  %v1785_v19 = vmul.f32 -1.442695, %v211_v13 }
  0xea   :  { %v1907_v16 = vpop.f32.mrf.mxu1  ;;  %v163_v17 = vpop.f32.mrf.mxu0 }
  0xeb   :  { %2101 = vpow2.f32 %v1785_v19 }
  0xec   :  { %v1901_v18 = vpop.f32.mrf.mxu0 }
  0xf8   :  { %v2102_v20 = vpop.eup %2101 }
  0xf9   :  { %v219_v21 = vadd.f32 1.0, %v2102_v20 }
  0xfb   :  { %2103 = vrcp.f32 %v219_v21 }
 0x108   :  { %v2104_v22 = vpop.eup %2103 }
 0x109   :  { %v233_v31 = vsub.f32 1.0, %v2104_v22 }
 0x15b   :  { %v224_v23 = vpop.permute.xlu0 %223 }
 0x15c   :  { %v226_v24 = vmul.f32 %v2104_v22, %v224_v23 }
 0x15e   :  { %228 = vrot.lane.b32.xlu0 %v226_v24, %s2226_s0 }
 0x1d0   :  { %v229_v25 = vpop.permute.xlu0 %228 }
 0x1d1   :  { %v231_v26 = vadd.f32 %v229_v25, %v211_v13 }
 0x1d3   :  { %2105 = vtanh.f32 %v231_v26 }
 0x1e0   :  { %v2106_v28 = vpop.eup %2105 }
 0x1e1   :  { %235 = vrot.lane.b32.xlu1 %v2106_v28, %s2231_s28 }
 0x1e5   :  { %240 = vrot.lane.b32.xlu1 %v46_v8, %s2230_s27 }
 0x253   :  { %v236_v30 = vpop.permute.xlu1 %235 }
 0x254   :  { %v238_v33 = vmul.f32 %v236_v30, %v233_v31 }
 0x257   :  { %v241_v32 = vpop.permute.xlu1 %240 }
 0x258   :  { %v243_v34 = vmul.f32 %v2104_v22, %v241_v32 }
 0x25a   :  { %v2323_v35 = vadd.f32 %v243_v34, %v238_v33 }
 0x25c   :  { %v245_v36 = vpack.c.bf16 %v2323_v35, %v2323_v35 }
 0x25e   :  { %247 = vrot.lane.b32.xlu0 %v245_v36, %s2231_s28 }
 0x2d0   :  { %v248_v37 = vpop.permute.xlu0 %247 }
 0x2d1   :  { %1913 = vmatmul.mubr.msk.bf16.vlgmr.msra.gmra.mxu1 %vm122_vm3, %v248_v37  ;;  %1921 = vmatmul.mubr.msk.bf16.vlgmr.msra.gmra.mxu0 %vm122_vm3, %v248_v37 }
 0x2d2   :  { %1925 = vmatpush3.bf16.msra.mxu1 %v2288_v5  ;;  %1926 = vmatprep.mubr.msk.bf16.mxu1 %vm2229_vm0, %v2228_v1 }
 0x2d3   :  { %1931 = vmatpush3.bf16.msra.mxu0 %v2313_v27  ;;  %1938 = vmatprep.subr.bf16.mxu1 %v2228_v1 }
 0x2d4   :  { %1932 = vmatprep.subr.bf16.mxu0 %v2228_v1  ;;  %1934 = vmatprep.mubr.msk.bf16.mxu0 %vm2229_vm0, %v2228_v1 }
 0x2d7   :  { %1933 = vmatpush3.bf16.msra.mxu0 %v2316_v29 }
 0x2d8   :  { %1946 = vmatprep.subr.bf16.mxu0 %v2228_v1 }
 0x391   :  { %v298_v39 = vpop.f32.mrf.mxu1  ;;  %v385_v40 = vpop.f32.mrf.mxu0 }
 0x392   :  { %v2346_v41 = vadd.f32 %v2343_v38, %v298_v39 }
 0x393   :  { %v1914_v42 = vpop.f32.mrf.mxu1  ;;  %v1922_v43 = vpop.f32.mrf.mxu0 }
 0x394   :  { %vm305_vm4 = vcmp.lt.s32.totalorder %v2346_v41, 0  ;;  %v306_v44 = vxor.u32 2147483647, %v2346_v41 }
 0x395   :  { %v301_v45 = vpop.f32.mrf.mxu1  ;;  %v388_v46 = vpop.f32.mrf.mxu0 }
 0x396   :  { %v307_v48 = vsel %vm305_vm4, %v306_v44, %v2346_v41 }
 0x397   :  { %v1915_v49 = vpop.f32.mrf.mxu1  ;;  %v1923_v50 = vpop.f32.mrf.mxu0  ;;  %v308_v51 = vand.u32 4294967280, %v307_v48 }
 0x399   :  { %v309_v52 = vor.u32 %v308_v51, %v2351_v47 }
 0x39b   :  { %v311_v53 = vsel %vm310_vm5, %v309_v52, 2147483648 }
 0x39c   :  { %v313_v54 = vshra.s32 %v311_v53, 16  ;;  %v312_v57 = vand.u32 65535, %v311_v53 }
 0x39e   :  { %v315_v55 = vcvt.s32.f32 %v313_v54  ;;  %v314_v59 = vcvt.s32.f32 %v312_v57 }
 0x3a0   :  { %316 = vmax.xlane.f32.xlu1 %v315_v55 }
 0x429   :  { %v317_v58 = vpop.xlane.xlu1 %316 }
 0x42a   :  { %vm318_vm6 = vcmp.eq.f32.partialorder %v315_v55, %v317_v58  ;;  %v323_v62 = vcvt.f32.s32 %v317_v58 }
 0x42b   :  { %v319_v60 = vsel %vm318_vm6, %v314_v59, -inf  ;;  %v2233_v59 = vmov 1  }
 0x42c   :  { %320 = vmax.xlane.f32.xlu0 %v319_v60  ;;  %v324_v0 = vshll.u32 %v323_v62, 16  ;;  %2090 = vset.pattern.permute.xlu1 %v2233_v59 }
 0x442   :  { %57 = vperm.xlu0 %2089, %v2359_v61  }
 0x4b5   :  { %v321_v63 = vpop.xlane.xlu0 %320 }
 0x4b6   :  { %v322_v3 = vcvt.f32.s32 %v321_v63 }
 0x4b8   :  { %v325_v6 = vadd.s32 %v324_v0, %v322_v3 }
 0x4ba   :  { %v326_v8 = vand.u32 15, %v325_v6 }
 0x4bc   :  { %v327_v9 = vsub.s32 15, %v326_v8 }
 0x4bd   :  { %v58_v11 = vpop.permute.xlu0 %57 }
 0x4be   :  { %vm328_vm7 = vcmp.eq.s32.totalorder %v2280_v2, %v327_v9  ;;  %vm59_vm8 = vcmp.eq.s32.totalorder %v2280_v2, %v58_v11 }
 0x4bf   :  { %v1789_v12 = vsel %vm328_vm7, 1.0, %v2228_v1  ;;  %v1772_v13 = vsel %vm59_vm8, 1.0, %v2228_v1 }
 0x4c0   :  { %v331_v14 = vpack.c.bf16 %v1789_v12, %v1789_v12  ;;  %v62_v15 = vpack.c.bf16 %v1772_v13, %v1772_v13 }
 0x4c2   :  { %v337_v16 = vsel %vm336_vm9, %v62_v15, %v331_v14  ;;  %v536_v15 = vstv %s535_s10 }
 0x4c3   :  { %1927 = vmatmul.mubr.msk.bf16.vlgmr.msra.gmra.mxu1 %vm172_vm2, %v337_v16  ;;  %vm537_vm14 = vcmp.eq.s32.totalorder %v536_v15, 1 }
 0x4c4   :  { %1939 = vmatpush3.bf16.msra.mxu1 %v2286_v4  ;;  %1942 = vmatprep.mubr.msk.bf16.mxu1 %vm2229_vm0, %v2228_v1 }
 0x4c5   :  { %1940 = vmatprep.subr.bf16.mxu1 %v2228_v1 }
 0x4c8   :  { %1941 = vmatpush3.bf16.msra.mxu1 %v2291_v7 }
 0x4c9   :  { %1952 = vmatprep.subr.bf16.mxu1 %v2228_v1 }
 0x583   :  { %v428_v17 = vpop.f32.mrf.mxu1 }
 0x584   :  { %v429_v18 = vadd.f32 %v428_v17, %v385_v40 }
 0x585   :  { %v1928_v19 = vpop.f32.mrf.mxu1 }
 0x586   :  { %441 = vrot.lane.b32.xlu1 %v429_v18, %s2230_s27  ;;  %v1792_v22 = vmul.f32 -1.442695, %v429_v18 }
 0x587   :  { %v431_v20 = vpop.f32.mrf.mxu1 }
 0x588   :  { %2107 = vpow2.f32 %v1792_v22 }
 0x589   :  { %v1929_v21 = vpop.f32.mrf.mxu1 }
 0x595   :  { %v2108_v23 = vpop.eup %2107 }
 0x596   :  { %v437_v24 = vadd.f32 1.0, %v2108_v23 }
 0x598   :  { %2109 = vrcp.f32 %v437_v24 }
 0x5a5   :  { %v2110_v25 = vpop.eup %2109 }
 0x5a6   :  { %v451_v33 = vsub.f32 1.0, %v2110_v25  ;;  %v457_v36 = vmul.f32 %v2110_v25, %v2323_v35 }
 0x5f8   :  { %v442_v26 = vpop.permute.xlu1 %441 }
 0x5f9   :  { %v444_v28 = vmul.f32 %v2110_v25, %v442_v26 }
 0x5fb   :  { %446 = vrot.lane.b32.xlu1 %v444_v28, %s2226_s0 }
 0x66d   :  { %v447_v30 = vpop.permute.xlu1 %446 }
 0x66e   :  { %v449_v31 = vadd.f32 %v447_v30, %v429_v18 }
 0x670   :  { %2111 = vtanh.f32 %v449_v31 }
 0x67d   :  { %v2112_v32 = vpop.eup %2111 }
 0x67e   :  { %453 = vrot.lane.b32.xlu1 %v2112_v32, %s2231_s28 }
 0x6f0   :  { %v454_v34 = vpop.permute.xlu1 %453 }
 0x6f1   :  { %v456_v37 = vmul.f32 %v454_v34, %v451_v33 }
 0x6f3   :  { %v2377_v39 = vadd.f32 %v457_v36, %v456_v37 }
 0x6f5   :  { %v459_v40 = vpack.c.bf16 %v2377_v39, %v2377_v39 }
 0x6f7   :  { %461 = vrot.lane.b32.xlu1 %v459_v40, %s2231_s28 }
 0x769   :  { %v462_v42 = vpop.permute.xlu1 %461 }
 0x76a   :  { %1935 = vmatmul.mubr.msk.bf16.vlgmr.msra.gmra.mxu0 %vm122_vm3, %v462_v42  ;;  %1943 = vmatmul.mubr.msk.bf16.vlgmr.msra.gmra.mxu1 %vm122_vm3, %v462_v42 }
 0x76b   :  { %1947 = vmatpush3.bf16.msra.mxu0 %v2288_v5  ;;  %1948 = vmatprep.mubr.msk.bf16.mxu0 %vm2229_vm0, %v2228_v1 }
 0x76c   :  { %1953 = vmatpush3.bf16.msra.mxu1 %v2313_v27  ;;  %1960 = vmatprep.subr.bf16.mxu0 %v2228_v1 }
 0x76d   :  { %1954 = vmatprep.subr.bf16.mxu1 %v2228_v1  ;;  %1956 = vmatprep.mubr.msk.bf16.mxu1 %vm2229_vm0, %v2228_v1 }
 0x770   :  { %1955 = vmatpush3.bf16.msra.mxu1 %v2316_v29 }
 0x771   :  { %1968 = vmatprep.subr.bf16.mxu1 %v2228_v1 }
 0x82a   :  { %v500_v35 = vpop.f32.mrf.mxu0  ;;  %v591_v43 = vpop.f32.mrf.mxu1 }
 0x82b   :  { %v2395_v44 = vadd.f32 %v2343_v38, %v500_v35 }
 0x82c   :  { %v1936_v45 = vpop.f32.mrf.mxu0  ;;  %v1944_v46 = vpop.f32.mrf.mxu1 }
 0x82d   :  { %vm507_vm10 = vcmp.lt.s32.totalorder %v2395_v44, 0  ;;  %v508_v48 = vxor.u32 2147483647, %v2395_v44 }
 0x82e   :  { %v503_v49 = vpop.f32.mrf.mxu0  ;;  %v594_v50 = vpop.f32.mrf.mxu1 }
 0x82f   :  { %v509_v51 = vsel %vm507_vm10, %v508_v48, %v2395_v44 }
 0x830   :  { %v1937_v52 = vpop.f32.mrf.mxu0  ;;  %v1945_v53 = vpop.f32.mrf.mxu1  ;;  %v510_v54 = vand.u32 4294967280, %v509_v51 }
 0x832   :  { %v511_v55 = vor.u32 %v510_v54, %v2351_v47 }
 0x834   :  { %v512_v56 = vsel %vm310_vm5, %v511_v55, 2147483648 }
 0x835   :  { %v514_v57 = vshra.s32 %v512_v56, 16  ;;  %v513_v60 = vand.u32 65535, %v512_v56 }
 0x837   :  { %v516_v58 = vcvt.s32.f32 %v514_v57  ;;  %v515_v63 = vcvt.s32.f32 %v513_v60 }
 0x839   :  { %517 = vmax.xlane.f32.xlu1 %v516_v58 }
 0x84a   :  { %64 = vperm.xlu1 %2090, %v2359_v61  }
 0x8c2   :  { %v518_v62 = vpop.xlane.xlu1 %517 }
 0x8c3   :  { %vm519_vm11 = vcmp.eq.f32.partialorder %v516_v58, %v518_v62  ;;  %v524_v3 = vcvt.f32.s32 %v518_v62 }
 0x8c4   :  { %v520_v0 = vsel %vm519_vm11, %v515_v63, -inf }
 0x8c5   :  { %521 = vmax.xlane.f32.xlu0 %v520_v0  ;;  %v525_v9 = vshll.u32 %v524_v3, 16  ;;  %v2234_v0 = vmov 2  }
 0x8c6   :  { %v65_v8 = vpop.permute.xlu1 %64  ;;  %2091 = vset.pattern.permute.xlu0 %v2234_v0 }
 0x8c7   :  { %vm66_vm12 = vcmp.eq.s32.totalorder %v2280_v2, %v65_v8 }
 0x8c8   :  { %v1773_v13 = vsel %vm66_vm12, 1.0, %v2228_v1 }
 0x8c9   :  { %v69_v16 = vpack.c.bf16 %v1773_v13, %v1773_v13 }
 0x94e   :  { %v522_v6 = vpop.xlane.xlu0 %521 }
 0x94f   :  { %v523_v10 = vcvt.f32.s32 %v522_v6 }
 0x951   :  { %v526_v11 = vadd.s32 %v525_v9, %v523_v10 }
 0x953   :  { %v527_v12 = vand.u32 15, %v526_v11 }
 0x955   :  { %v528_v14 = vsub.s32 15, %v527_v12 }
 0x957   :  { %vm529_vm13 = vcmp.eq.s32.totalorder %v2280_v2, %v528_v14 }
 0x958   :  { %v1794_v17 = vsel %vm529_vm13, 1.0, %v2228_v1 }
 0x959   :  { %v532_v18 = vpack.c.bf16 %v1794_v17, %v1794_v17  ;;  %v742_v17 = vstv %s741_s12  ;;  %s2242_s12 = smov 112  }
 0x95a   :  { %vm743_vm7 = vcmp.eq.s32.totalorder %v742_v17, 1 }
 0x95b   :  { %v538_v19 = vsel %vm537_vm14, %v69_v16, %v532_v18 }
 0x95c   :  { %1949 = vmatmul.mubr.msk.bf16.vlgmr.msra.gmra.mxu0 %vm172_vm2, %v538_v19 }
 0x95d   :  { %1961 = vmatpush3.bf16.msra.mxu0 %v2286_v4  ;;  %1964 = vmatprep.mubr.msk.bf16.mxu0 %vm2229_vm0, %v2228_v1 }
 0x95e   :  { %1962 = vmatprep.subr.bf16.mxu0 %v2228_v1 }
 0x961   :  { %1963 = vmatpush3.bf16.msra.mxu0 %v2291_v7 }
 0x962   :  { %1974 = vmatprep.subr.bf16.mxu0 %v2228_v1 }
 0xa1c   :  { %v634_v20 = vpop.f32.mrf.mxu0 }
 0xa1d   :  { %v635_v21 = vadd.f32 %v634_v20, %v591_v43 }
 0xa1e   :  { %v1950_v22 = vpop.f32.mrf.mxu0 }
 0xa1f   :  { %647 = vrot.lane.b32.xlu0 %v635_v21, %s2230_s27  ;;  %v1798_v25 = vmul.f32 -1.442695, %v635_v21 }
 0xa20   :  { %v637_v23 = vpop.f32.mrf.mxu0 }
 0xa21   :  { %2113 = vpow2.f32 %v1798_v25 }
 0xa22   :  { %v1951_v24 = vpop.f32.mrf.mxu0 }
 0xa2e   :  { %v2114_v26 = vpop.eup %2113 }
 0xa2f   :  { %v643_v28 = vadd.f32 1.0, %v2114_v26 }
 0xa31   :  { %2115 = vrcp.f32 %v643_v28 }
 0xa3e   :  { %v2116_v30 = vpop.eup %2115 }
 0xa3f   :  { %v657_v37 = vsub.f32 1.0, %v2116_v30  ;;  %v663_v42 = vmul.f32 %v2116_v30, %v2377_v39 }
 0xa91   :  { %v648_v31 = vpop.permute.xlu0 %647 }
 0xa92   :  { %v650_v32 = vmul.f32 %v2116_v30, %v648_v31 }
 0xa94   :  { %652 = vrot.lane.b32.xlu1 %v650_v32, %s2226_s0 }
 0xb06   :  { %v653_v33 = vpop.permute.xlu1 %652 }
 0xb07   :  { %v655_v34 = vadd.f32 %v653_v33, %v635_v21 }
 0xb09   :  { %2117 = vtanh.f32 %v655_v34 }
 0xb16   :  { %v2118_v36 = vpop.eup %2117 }
 0xb17   :  { %659 = vrot.lane.b32.xlu1 %v2118_v36, %s2231_s28 }
 0xb89   :  { %v660_v40 = vpop.permute.xlu1 %659 }
 0xb8a   :  { %v662_v35 = vmul.f32 %v660_v40, %v657_v37 }
 0xb8c   :  { %v2418_v43 = vadd.f32 %v663_v42, %v662_v35 }
 0xb8e   :  { %v665_v45 = vpack.c.bf16 %v2418_v43, %v2418_v43 }
 0xb90   :  { %667 = vrot.lane.b32.xlu1 %v665_v45, %s2231_s28 }
 0xc02   :  { %v668_v46 = vpop.permute.xlu1 %667 }
 0xc03   :  { %1957 = vmatmul.mubr.msk.bf16.vlgmr.msra.gmra.mxu1 %vm122_vm3, %v668_v46  ;;  %1965 = vmatmul.mubr.msk.bf16.vlgmr.msra.gmra.mxu0 %vm122_vm3, %v668_v46 }
 0xc04   :  { %1969 = vmatpush3.bf16.msra.mxu1 %v2288_v5  ;;  %1970 = vmatprep.mubr.msk.bf16.mxu1 %vm2229_vm0, %v2228_v1 }
 0xc05   :  { %1975 = vmatpush3.bf16.msra.mxu0 %v2313_v27  ;;  %1982 = vmatprep.subr.bf16.mxu1 %v2228_v1 }
 0xc06   :  { %1976 = vmatprep.subr.bf16.mxu0 %v2228_v1  ;;  %1978 = vmatprep.mubr.msk.bf16.mxu0 %vm2229_vm0, %v2228_v1 }
 0xc09   :  { %1977 = vmatpush3.bf16.msra.mxu0 %v2316_v29 }
 0xc0a   :  { %1990 = vmatprep.subr.bf16.mxu0 %v2228_v1 }
 0xcc3   :  { %v706_v39 = vpop.f32.mrf.mxu1  ;;  %v797_v48 = vpop.f32.mrf.mxu0 }
 0xcc4   :  { %v2436_v49 = vadd.f32 %v2343_v38, %v706_v39 }
 0xcc5   :  { %v1958_v50 = vpop.f32.mrf.mxu1  ;;  %v1966_v51 = vpop.f32.mrf.mxu0 }
 0xcc6   :  { %vm713_vm15 = vcmp.lt.s32.totalorder %v2436_v49, 0  ;;  %v714_v52 = vxor.u32 2147483647, %v2436_v49 }
 0xcc7   :  { %v709_v53 = vpop.f32.mrf.mxu1  ;;  %v800_v54 = vpop.f32.mrf.mxu0 }
 0xcc8   :  { %v715_v55 = vsel %vm713_vm15, %v714_v52, %v2436_v49 }
 0xcc9   :  { %v1959_v56 = vpop.f32.mrf.mxu1  ;;  %v1967_v57 = vpop.f32.mrf.mxu0  ;;  %v716_v58 = vand.u32 4294967280, %v715_v55 }
 0xccb   :  { %v717_v59 = vor.u32 %v716_v58, %v2351_v47 }
 0xccd   :  { %v718_v60 = vsel %vm310_vm5, %v717_v59, 2147483648 }
 0xcce   :  { %v720_v62 = vshra.s32 %v718_v60, 16  ;;  %v719_v3 = vand.u32 65535, %v718_v60 }
 0xcd0   :  { %v722_v63 = vcvt.s32.f32 %v720_v62  ;;  %v721_v8 = vcvt.s32.f32 %v719_v3 }
 0xcd2   :  { %723 = vmax.xlane.f32.xlu1 %v722_v63 }
 0xd5b   :  { %v724_v6 = vpop.xlane.xlu1 %723 }
 0xd5c   :  { %vm725_vm1 = vcmp.eq.f32.partialorder %v722_v63, %v724_v6  ;;  %v730_v10 = vcvt.f32.s32 %v724_v6 }
 0xd5d   :  { %v726_v9 = vsel %vm725_vm1, %v721_v8, -inf }
 0xd5e   :  { %727 = vmax.xlane.f32.xlu0 %v726_v9  ;;  %v731_v12 = vshll.u32 %v730_v10, 16  ;;  %v2235_v10 = vmov 3  }
 0xd5f   :  { %2092 = vset.pattern.permute.xlu1 %v2235_v10 }
 0xd74   :  { %71 = vperm.xlu0 %2091, %v2359_v61  }
 0xde7   :  { %v728_v11 = vpop.xlane.xlu0 %727 }
 0xde8   :  { %v729_v13 = vcvt.f32.s32 %v728_v11 }
 0xdea   :  { %v732_v14 = vadd.s32 %v731_v12, %v729_v13 }
 0xdec   :  { %v733_v15 = vand.u32 15, %v732_v14 }
 0xdee   :  { %v734_v16 = vsub.s32 15, %v733_v15 }
 0xdef   :  { %v72_v18 = vpop.permute.xlu0 %71 }
 0xdf0   :  { %vm735_vm4 = vcmp.eq.s32.totalorder %v2280_v2, %v734_v16  ;;  %vm73_vm6 = vcmp.eq.s32.totalorder %v2280_v2, %v72_v18 }
 0xdf1   :  { %v1800_v19 = vsel %vm735_vm4, 1.0, %v2228_v1  ;;  %v1774_v20 = vsel %vm73_vm6, 1.0, %v2228_v1 }
 0xdf2   :  { %v738_v21 = vpack.c.bf16 %v1800_v19, %v1800_v19  ;;  %v76_v22 = vpack.c.bf16 %v1774_v20, %v1774_v20 }
 0xdf4   :  { %v744_v23 = vsel %vm743_vm7, %v76_v22, %v738_v21 }
 0xdf5   :  { %1971 = vmatmul.mubr.msk.bf16.vlgmr.msra.gmra.mxu1 %vm172_vm2, %v744_v23 }
 0xdf6   :  { %1983 = vmatpush3.bf16.msra.mxu1 %v2286_v4  ;;  %1986 = vmatprep.mubr.msk.bf16.mxu1 %vm2229_vm0, %v2228_v1 }
 0xdf7   :  { %1984 = vmatprep.subr.bf16.mxu1 %v2228_v1 }
 0xdfa   :  { %1985 = vmatpush3.bf16.msra.mxu1 %v2291_v7 }
 0xdfb   :  { %1996 = vmatprep.subr.bf16.mxu1 %v2228_v1 }
 0xeb5   :  { %v840_v24 = vpop.f32.mrf.mxu1 }
 0xeb6   :  { %v841_v25 = vadd.f32 %v840_v24, %v797_v48  ;;  %v948_v24 = vstv %s947_s14 }
 0xeb7   :  { %v1972_v26 = vpop.f32.mrf.mxu1  ;;  %vm949_vm12 = vcmp.eq.s32.totalorder %v948_v24, 1 }
 0xeb8   :  { %853 = vrot.lane.b32.xlu1 %v841_v25, %s2230_s27  ;;  %v1804_v31 = vmul.f32 -1.442695, %v841_v25 }
 0xeb9   :  { %v843_v28 = vpop.f32.mrf.mxu1 }
 0xeba   :  { %2119 = vpow2.f32 %v1804_v31 }
 0xebb   :  { %v1973_v30 = vpop.f32.mrf.mxu1 }
 0xec7   :  { %v2120_v32 = vpop.eup %2119 }
 0xec8   :  { %v849_v33 = vadd.f32 1.0, %v2120_v32 }
 0xeca   :  { %2121 = vrcp.f32 %v849_v33 }
 0xed7   :  { %v2122_v34 = vpop.eup %2121 }
 0xed8   :  { %v863_v45 = vsub.f32 1.0, %v2122_v34  ;;  %v869_v39 = vmul.f32 %v2122_v34, %v2418_v43 }
 0xf2a   :  { %v854_v36 = vpop.permute.xlu1 %853 }
 0xf2b   :  { %v856_v37 = vmul.f32 %v2122_v34, %v854_v36 }
 0xf2d   :  { %858 = vrot.lane.b32.xlu1 %v856_v37, %s2226_s0 }
 0xf9f   :  { %v859_v40 = vpop.permute.xlu1 %858 }
 0xfa0   :  { %v861_v42 = vadd.f32 %v859_v40, %v841_v25 }
 0xfa2   :  { %2123 = vtanh.f32 %v861_v42 }
 0xfaf   :  { %v2124_v35 = vpop.eup %2123 }
 0xfb0   :  { %865 = vrot.lane.b32.xlu1 %v2124_v35, %s2231_s28 }
0x1022   :  { %v866_v46 = vpop.permute.xlu1 %865 }
0x1023   :  { %v868_v48 = vmul.f32 %v866_v46, %v863_v45 }
0x1025   :  { %v2459_v50 = vadd.f32 %v869_v39, %v868_v48 }
0x1027   :  { %v871_v51 = vpack.c.bf16 %v2459_v50, %v2459_v50 }
0x1029   :  { %873 = vrot.lane.b32.xlu1 %v871_v51, %s2231_s28 }
0x109b   :  { %v874_v52 = vpop.permute.xlu1 %873 }
0x109c   :  { %1979 = vmatmul.mubr.msk.bf16.vlgmr.msra.gmra.mxu0 %vm122_vm3, %v874_v52  ;;  %1987 = vmatmul.mubr.msk.bf16.vlgmr.msra.gmra.mxu1 %vm122_vm3, %v874_v52 }
0x109d   :  { %1991 = vmatpush3.bf16.msra.mxu0 %v2288_v5  ;;  %1992 = vmatprep.mubr.msk.bf16.mxu0 %vm2229_vm0, %v2228_v1 }
0x109e   :  { %1997 = vmatpush3.bf16.msra.mxu1 %v2313_v27  ;;  %2004 = vmatprep.subr.bf16.mxu0 %v2228_v1 }
0x109f   :  { %1998 = vmatprep.subr.bf16.mxu1 %v2228_v1  ;;  %2000 = vmatprep.mubr.msk.bf16.mxu1 %vm2229_vm0, %v2228_v1 }
0x10a2   :  { %1999 = vmatpush3.bf16.msra.mxu1 %v2316_v29 }
0x10a3   :  { %2012 = vmatprep.subr.bf16.mxu1 %v2228_v1 }
0x115c   :  { %v912_v43 = vpop.f32.mrf.mxu0  ;;  %v1003_v53 = vpop.f32.mrf.mxu1 }
0x115d   :  { %v2477_v54 = vadd.f32 %v2343_v38, %v912_v43 }
0x115e   :  { %v1980_v55 = vpop.f32.mrf.mxu0  ;;  %v1988_v56 = vpop.f32.mrf.mxu1 }
0x115f   :  { %vm919_vm8 = vcmp.lt.s32.totalorder %v2477_v54, 0  ;;  %v920_v57 = vxor.u32 2147483647, %v2477_v54 }
0x1160   :  { %v915_v58 = vpop.f32.mrf.mxu0  ;;  %v1006_v59 = vpop.f32.mrf.mxu1 }
0x1161   :  { %v921_v60 = vsel %vm919_vm8, %v920_v57, %v2477_v54 }
0x1162   :  { %v1981_v62 = vpop.f32.mrf.mxu0  ;;  %v1989_v63 = vpop.f32.mrf.mxu1  ;;  %v922_v0 = vand.u32 4294967280, %v921_v60 }
0x1164   :  { %v923_v3 = vor.u32 %v922_v0, %v2351_v47 }
0x1166   :  { %v924_v6 = vsel %vm310_vm5, %v923_v3, 2147483648 }
0x1167   :  { %v926_v8 = vshra.s32 %v924_v6, 16  ;;  %v925_v11 = vand.u32 65535, %v924_v6 }
0x1169   :  { %v928_v9 = vcvt.s32.f32 %v926_v8  ;;  %v927_v13 = vcvt.s32.f32 %v925_v11 }
0x116b   :  { %929 = vmax.xlane.f32.xlu1 %v928_v9 }
0x117c   :  { %78 = vperm.xlu1 %2092, %v2359_v61  }
0x11f4   :  { %v930_v12 = vpop.xlane.xlu1 %929 }
0x11f5   :  { %vm931_vm9 = vcmp.eq.f32.partialorder %v928_v9, %v930_v12  ;;  %v936_v15 = vcvt.f32.s32 %v930_v12 }
0x11f6   :  { %v932_v14 = vsel %vm931_vm9, %v927_v13, -inf }
0x11f7   :  { %933 = vmax.xlane.f32.xlu0 %v932_v14  ;;  %v937_v18 = vshll.u32 %v936_v15, 16  ;;  %v2236_v15 = vmov 4  }
0x11f8   :  { %v79_v17 = vpop.permute.xlu1 %78  ;;  %2093 = vset.pattern.permute.xlu0 %v2236_v15 }
0x11f9   :  { %vm80_vm10 = vcmp.eq.s32.totalorder %v2280_v2, %v79_v17 }
0x11fa   :  { %v1775_v22 = vsel %vm80_vm10, 1.0, %v2228_v1 }
0x11fb   :  { %v83_v25 = vpack.c.bf16 %v1775_v22, %v1775_v22 }
0x1280   :  { %v934_v16 = vpop.xlane.xlu0 %933 }
0x1281   :  { %v935_v19 = vcvt.f32.s32 %v934_v16 }
0x1283   :  { %v938_v20 = vadd.s32 %v937_v18, %v935_v19 }
0x1285   :  { %v939_v21 = vand.u32 15, %v938_v20 }
0x1287   :  { %v940_v23 = vsub.s32 15, %v939_v21 }
0x1289   :  { %vm941_vm11 = vcmp.eq.s32.totalorder %v2280_v2, %v940_v23 }
0x128a   :  { %v1806_v26 = vsel %vm941_vm11, 1.0, %v2228_v1 }
0x128b   :  { %v944_v28 = vpack.c.bf16 %v1806_v26, %v1806_v26 }
0x128d   :  { %v950_v30 = vsel %vm949_vm12, %v83_v25, %v944_v28 }
0x128e   :  { %1993 = vmatmul.mubr.msk.bf16.vlgmr.msra.gmra.mxu0 %vm172_vm2, %v950_v30 }
0x128f   :  { %2005 = vmatpush3.bf16.msra.mxu0 %v2286_v4  ;;  %2008 = vmatprep.mubr.msk.bf16.mxu0 %vm2229_vm0, %v2228_v1 }
0x1290   :  { %2006 = vmatprep.subr.bf16.mxu0 %v2228_v1 }
0x1293   :  { %2007 = vmatpush3.bf16.msra.mxu0 %v2291_v7 }
0x1294   :  { %2018 = vmatprep.subr.bf16.mxu0 %v2228_v1 }
0x134e   :  { %v1046_v31 = vpop.f32.mrf.mxu0 }
0x134f   :  { %v1047_v32 = vadd.f32 %v1046_v31, %v1003_v53  ;;  %v1154_v31 = vstv %s1153_s16 }
0x1350   :  { %v1994_v33 = vpop.f32.mrf.mxu0  ;;  %vm1155_vm4 = vcmp.eq.s32.totalorder %v1154_v31, 1 }
0x1351   :  { %1059 = vrot.lane.b32.xlu0 %v1047_v32, %s2230_s27  ;;  %v1810_v37 = vmul.f32 -1.442695, %v1047_v32 }
0x1352   :  { %v1049_v34 = vpop.f32.mrf.mxu0 }
0x1353   :  { %2125 = vpow2.f32 %v1810_v37 }
0x1354   :  { %v1995_v36 = vpop.f32.mrf.mxu0 }
0x1360   :  { %v2126_v40 = vpop.eup %2125 }
0x1361   :  { %v1055_v42 = vadd.f32 1.0, %v2126_v40 }
0x1363   :  { %2127 = vrcp.f32 %v1055_v42 }
0x1370   :  { %v2128_v35 = vpop.eup %2127 }
0x1371   :  { %v1069_v52 = vsub.f32 1.0, %v2128_v35  ;;  %v1075_v53 = vmul.f32 %v2128_v35, %v2459_v50 }
0x13c3   :  { %v1060_v45 = vpop.permute.xlu0 %1059 }
0x13c4   :  { %v1062_v46 = vmul.f32 %v2128_v35, %v1060_v45 }
0x13c6   :  { %1064 = vrot.lane.b32.xlu1 %v1062_v46, %s2226_s0 }
0x1438   :  { %v1065_v39 = vpop.permute.xlu1 %1064 }
0x1439   :  { %v1067_v48 = vadd.f32 %v1065_v39, %v1047_v32 }
0x143b   :  { %2129 = vtanh.f32 %v1067_v48 }
0x1448   :  { %v2130_v51 = vpop.eup %2129 }
0x1449   :  { %1071 = vrot.lane.b32.xlu1 %v2130_v51, %s2231_s28 }
0x14bb   :  { %v1072_v43 = vpop.permute.xlu1 %1071 }
0x14bc   :  { %v1074_v55 = vmul.f32 %v1072_v43, %v1069_v52 }
0x14be   :  { %v2500_v56 = vadd.f32 %v1075_v53, %v1074_v55 }
0x14c0   :  { %v1077_v57 = vpack.c.bf16 %v2500_v56, %v2500_v56 }
0x14c2   :  { %1079 = vrot.lane.b32.xlu1 %v1077_v57, %s2231_s28 }
0x1534   :  { %v1080_v58 = vpop.permute.xlu1 %1079 }
0x1535   :  { %2001 = vmatmul.mubr.msk.bf16.vlgmr.msra.gmra.mxu1 %vm122_vm3, %v1080_v58  ;;  %2009 = vmatmul.mubr.msk.bf16.vlgmr.msra.gmra.mxu0 %vm122_vm3, %v1080_v58 }
0x1536   :  { %2013 = vmatpush3.bf16.msra.mxu1 %v2288_v5  ;;  %2014 = vmatprep.mubr.msk.bf16.mxu1 %vm2229_vm0, %v2228_v1 }
0x1537   :  { %2019 = vmatpush3.bf16.msra.mxu0 %v2313_v27  ;;  %2026 = vmatprep.subr.bf16.mxu1 %v2228_v1 }
0x1538   :  { %2020 = vmatprep.subr.bf16.mxu0 %v2228_v1  ;;  %2022 = vmatprep.mubr.msk.bf16.mxu0 %vm2229_vm0, %v2228_v1 }
0x153b   :  { %2021 = vmatpush3.bf16.msra.mxu0 %v2316_v29 }
0x153c   :  { %2034 = vmatprep.subr.bf16.mxu0 %v2228_v1 }
0x15f5   :  { %v1118_v50 = vpop.f32.mrf.mxu1  ;;  %v1209_v59 = vpop.f32.mrf.mxu0 }
0x15f6   :  { %v2518_v5 = vadd.f32 %v2343_v38, %v1118_v50 }
0x15f7   :  { %v2002_v60 = vpop.f32.mrf.mxu1  ;;  %v2010_v62 = vpop.f32.mrf.mxu0 }
0x15f8   :  { %vm1125_vm13 = vcmp.lt.s32.totalorder %v2518_v5, 0  ;;  %v1126_v63 = vxor.u32 2147483647, %v2518_v5 }
0x15f9   :  { %v1121_v0 = vpop.f32.mrf.mxu1  ;;  %v1212_v3 = vpop.f32.mrf.mxu0 }
0x15fa   :  { %v1127_v6 = vsel %vm1125_vm13, %v1126_v63, %v2518_v5  ;;  %v2548_v63 = vld [vmem:[#allocation4] sm:$0xff]  }
0x15fb   :  { %v2003_v8 = vpop.f32.mrf.mxu1  ;;  %v2011_v9 = vpop.f32.mrf.mxu0  ;;  %v1128_v10 = vand.u32 4294967280, %v1127_v6 }
0x15fd   :  { %v1129_v11 = vor.u32 %v1128_v10, %v2351_v47 }
0x15ff   :  { %v1130_v12 = vsel %vm310_vm5, %v1129_v11, 2147483648 }
0x1600   :  { %v1132_v13 = vshra.s32 %v1130_v12, 16  ;;  %v1131_v16 = vand.u32 65535, %v1130_v12 }
0x1602   :  { %v1134_v14 = vcvt.s32.f32 %v1132_v13  ;;  %v1133_v18 = vcvt.s32.f32 %v1131_v16 }
0x1604   :  { %1135 = vmax.xlane.f32.xlu0 %v1134_v14 }
0x161a   :  { %85 = vperm.xlu0 %2093, %v2359_v61  }
0x168d   :  { %v1136_v17 = vpop.xlane.xlu0 %1135 }
0x168e   :  { %vm1137_vm14 = vcmp.eq.f32.partialorder %v1134_v14, %v1136_v17  ;;  %v1142_v20 = vcvt.f32.s32 %v1136_v17  ;;  %v2237_v17 = vmov 5  }
0x168f   :  { %v1138_v19 = vsel %vm1137_vm14, %v1133_v18, -inf  ;;  %2094 = vset.pattern.permute.xlu1 %v2237_v17 }
0x1690   :  { %1139 = vmax.xlane.f32.xlu1 %v1138_v19  ;;  %v1143_v23 = vshll.u32 %v1142_v20, 16 }
0x1695   :  { %v86_v22 = vpop.permute.xlu0 %85 }
0x1696   :  { %vm87_vm15 = vcmp.eq.s32.totalorder %v2280_v2, %v86_v22 }
0x1697   :  { %v1776_v28 = vsel %vm87_vm15, 1.0, %v2228_v1  ;;  %vm1173_vm15 = vcmask 650752  }
0x1698   :  { %v90_v32 = vpack.c.bf16 %v1776_v28, %v1776_v28 }
0x1719   :  { %v1140_v21 = vpop.xlane.xlu1 %1139 }
0x171a   :  { %v1141_v24 = vcvt.f32.s32 %v1140_v21 }
0x171c   :  { %v1144_v25 = vadd.s32 %v1143_v23, %v1141_v24 }
0x171e   :  { %v1145_v26 = vand.u32 15, %v1144_v25 }
0x1720   :  { %v1146_v30 = vsub.s32 15, %v1145_v26 }
0x1722   :  { %vm1147_vm1 = vcmp.eq.s32.totalorder %v2280_v2, %v1146_v30 }
0x1723   :  { %v1812_v33 = vsel %vm1147_vm1, 1.0, %v2228_v1  ;;  %vm1379_vm1 = vcmask 781952  }
0x1724   :  { %v1150_v34 = vpack.c.bf16 %v1812_v33, %v1812_v33 }
0x1726   :  { %v1156_v36 = vsel %vm1155_vm4, %v90_v32, %v1150_v34  ;;  %v1360_v32 = vstv %s1359_s18  ;;  %vm1585_vm4 = vcmask 913152  }
0x1727   :  { %2015 = vmatmul.mubr.msk.bf16.vlgmr.msra.gmra.mxu1 %vm172_vm2, %v1156_v36  ;;  %vm1361_vm10 = vcmp.eq.s32.totalorder %v1360_v32, 1 }
0x1728   :  { %2027 = vmatpush3.bf16.msra.mxu1 %v2286_v4  ;;  %2030 = vmatprep.mubr.msk.bf16.mxu1 %vm2229_vm0, %v2228_v1 }
0x1729   :  { %2028 = vmatprep.subr.bf16.mxu1 %v2228_v1 }
0x172c   :  { %2029 = vmatpush3.bf16.msra.mxu1 %v2291_v7 }
0x172d   :  { %2040 = vmatprep.subr.bf16.mxu1 %v2228_v1 }
0x17e7   :  { %v1252_v37 = vpop.f32.mrf.mxu1 }
0x17e8   :  { %v1253_v40 = vadd.f32 %v1252_v37, %v1209_v59 }
0x17e9   :  { %v2016_v42 = vpop.f32.mrf.mxu1 }
0x17ea   :  { %1265 = vrot.lane.b32.xlu1 %v1253_v40, %s2230_s27  ;;  %v1816_v46 = vmul.f32 -1.442695, %v1253_v40  ;;  %v2183_v42 = vld [vmem:[#allocation4 + $0x8] sm:$0xff]  }
0x17eb   :  { %v1255_v35 = vpop.f32.mrf.mxu1 }
0x17ec   :  { %2131 = vpow2.f32 %v1816_v46 }
0x17ed   :  { %v2017_v45 = vpop.f32.mrf.mxu1 }
0x17f9   :  { %v2132_v39 = vpop.eup %2131 }
0x17fa   :  { %v1261_v4 = vadd.f32 1.0, %v2132_v39 }
0x17fc   :  { %2133 = vrcp.f32 %v1261_v4 }
0x1809   :  { %v2134_v48 = vpop.eup %2133 }
0x180a   :  { %v1275_v55 = vsub.f32 1.0, %v2134_v48  ;;  %v1281_v58 = vmul.f32 %v2134_v48, %v2500_v56 }
0x185c   :  { %v1266_v51 = vpop.permute.xlu1 %1265 }
0x185d   :  { %v1268_v52 = vmul.f32 %v2134_v48, %v1266_v51 }
0x185f   :  { %1270 = vrot.lane.b32.xlu1 %v1268_v52, %s2226_s0 }
0x18d1   :  { %v1271_v7 = vpop.permute.xlu1 %1270 }
0x18d2   :  { %v1273_v43 = vadd.f32 %v1271_v7, %v1253_v40  ;;  %v2182_v40 = vld [vmem:[#allocation4 + $0x10] sm:$0xff]  }
0x18d4   :  { %2135 = vtanh.f32 %v1273_v43 }
0x18e1   :  { %v2136_v53 = vpop.eup %2135 }
0x18e2   :  { %1277 = vrot.lane.b32.xlu1 %v2136_v53, %s2231_s28 }
0x1954   :  { %v1278_v57 = vpop.permute.xlu1 %1277 }
0x1955   :  { %v1280_v50 = vmul.f32 %v1278_v57, %v1275_v55 }
0x1957   :  { %v2541_v59 = vadd.f32 %v1281_v58, %v1280_v50 }
0x1959   :  { %v1283_v60 = vpack.c.bf16 %v2541_v59, %v2541_v59 }
0x195b   :  { %1285 = vrot.lane.b32.xlu1 %v1283_v60, %s2231_s28 }
0x19cd   :  { %v1286_v62 = vpop.permute.xlu1 %1285 }
0x19ce   :  { %2023 = vmatmul.mubr.msk.bf16.vlgmr.msra.gmra.mxu0 %vm122_vm3, %v1286_v62  ;;  %2031 = vmatmul.mubr.msk.bf16.vlgmr.msra.gmra.mxu1 %vm122_vm3, %v1286_v62 }
0x19cf   :  { %2035 = vmatpush3.bf16.msra.mxu0 %v2548_v63  ;;  %2036 = vmatprep.mubr.msk.bf16.mxu0 %vm2229_vm0, %v2228_v1 }
0x19d0   :  { %2041 = vmatpush3.bf16.msra.mxu1 %v2313_v27  ;;  %2048 = vmatprep.subr.bf16.mxu0 %v2228_v1 }
0x19d1   :  { %2042 = vmatprep.subr.bf16.mxu1 %v2228_v1  ;;  %2044 = vmatprep.mubr.msk.bf16.mxu1 %vm2229_vm0, %v2228_v1 }
0x19d4   :  { %2043 = vmatpush3.bf16.msra.mxu1 %v2316_v29 }
0x19d5   :  { %2056 = vmatprep.subr.bf16.mxu1 %v2228_v1 }
0x1a8e   :  { %v1324_v56 = vpop.f32.mrf.mxu0  ;;  %v1415_v0 = vpop.f32.mrf.mxu1 }
0x1a8f   :  { %v2561_v3 = vadd.f32 %v2343_v38, %v1324_v56 }
0x1a90   :  { %v2024_v6 = vpop.f32.mrf.mxu0  ;;  %v2032_v8 = vpop.f32.mrf.mxu1 }
0x1a91   :  { %vm1331_vm6 = vcmp.lt.s32.totalorder %v2561_v3, 0  ;;  %v1332_v27 = vxor.u32 2147483647, %v2561_v3 }
0x1a92   :  { %v1327_v9 = vpop.f32.mrf.mxu0  ;;  %v1418_v10 = vpop.f32.mrf.mxu1 }
0x1a93   :  { %v1333_v11 = vsel %vm1331_vm6, %v1332_v27, %v2561_v3  ;;  %v2184_v27 = vld [vmem:[#allocation4 + $0x20] sm:$0xff]   ;;  %v2238_v9 = vmov 6   ;;  %vm1764_vm6 = vcmask 257024  }
0x1a94   :  { %v2025_v12 = vpop.f32.mrf.mxu0  ;;  %v2033_v13 = vpop.f32.mrf.mxu1  ;;  %v1334_v29 = vand.u32 4294967280, %v1333_v11  ;;  %2095 = vset.pattern.permute.xlu0 %v2238_v9 }
0x1a96   :  { %v1335_v14 = vor.u32 %v1334_v29, %v2351_v47 }
0x1a98   :  { %v1336_v15 = vsel %vm310_vm5, %v1335_v14, 2147483648 }
0x1a99   :  { %v1338_v16 = vshra.s32 %v1336_v15, 16  ;;  %v1337_v18 = vand.u32 65535, %v1336_v15 }
0x1a9b   :  { %v1340_v38 = vcvt.s32.f32 %v1338_v16  ;;  %v1339_v20 = vcvt.s32.f32 %v1337_v18 }
0x1a9d   :  { %1341 = vmax.xlane.f32.xlu1 %v1340_v38 }
0x1aae   :  { %92 = vperm.xlu1 %2094, %v2359_v61  }
0x1b26   :  { %v1342_v19 = vpop.xlane.xlu1 %1341 }
0x1b27   :  { %vm1343_vm7 = vcmp.eq.f32.partialorder %v1340_v38, %v1342_v19  ;;  %v1348_v22 = vcvt.f32.s32 %v1342_v19 }
0x1b28   :  { %v1344_v21 = vsel %vm1343_vm7, %v1339_v20, -inf  ;;  %vm1758_vm7 = vcmask 1044352  }
0x1b29   :  { %1345 = vmax.xlane.f32.xlu0 %v1344_v21  ;;  %v1349_v25 = vshll.u32 %v1348_v22, 16 }
0x1b2a   :  { %v93_v24 = vpop.permute.xlu1 %92 }
0x1b2b   :  { %vm94_vm8 = vcmp.eq.s32.totalorder %v2280_v2, %v93_v24  ;;  %v2187_v24 = vld [vmem:[%s2707_s3] sm:$0xf]  ;;  %s1825_s3 = sld [smem:[#allocation3 + $0x6]] }
0x1b2c   :  { %v1777_v61 = vsel %vm94_vm8, 1.0, %v2228_v1 }
0x1b2d   :  { %v97_v33 = vpack.c.bf16 %v1777_v61, %v1777_v61 }
0x1b31   :  { %p1564_p2 = scmp.eq.s32.totalorder %s1825_s3, 1 }
0x1b33   :  { %s1565_s22 = scalar_select %p1564_p2, 1, 0 }
0x1bb2   :  { %v1346_v23 = vpop.xlane.xlu0 %1345 }
0x1bb3   :  { %v1347_v26 = vcvt.f32.s32 %v1346_v23 }
0x1bb5   :  { %v1350_v28 = vadd.s32 %v1349_v25, %v1347_v26  ;;  %v745_v25 = vsel %vm310_vm5, %v2436_v49, -inf  ;;  %v1157_v26 = vsel %vm310_vm5, %v2518_v5, -inf }
0x1bb7   :  { %v1351_v30 = vand.u32 15, %v1350_v28  ;;  %v338_v28 = vsel %vm310_vm5, %v2346_v41, -inf }
0x1bb9   :  { %v1352_v31 = vsub.s32 15, %v1351_v30 }
0x1bbb   :  { %vm1353_vm9 = vcmp.eq.s32.totalorder %v2280_v2, %v1352_v31 }
0x1bbc   :  { %v1818_v34 = vsel %vm1353_vm9, 1.0, %v2228_v1 }
0x1bbd   :  { %v1356_v36 = vpack.c.bf16 %v1818_v34, %v1818_v34 }
0x1bbf   :  { %v1362_v37 = vsel %vm1361_vm10, %v97_v33, %v1356_v36 }
0x1bc0   :  { %2037 = vmatmul.mubr.msk.bf16.vlgmr.msra.gmra.mxu0 %vm172_vm2, %v1362_v37 }
0x1bc1   :  { %2049 = vmatpush3.bf16.msra.mxu0 %v2182_v40  ;;  %2052 = vmatprep.mubr.msk.bf16.mxu0 %vm2229_vm0, %v2228_v1 }
0x1bc2   :  { %2050 = vmatprep.subr.bf16.mxu0 %v2228_v1 }
0x1bc5   :  { %2051 = vmatpush3.bf16.msra.mxu0 %v2183_v42 }
0x1bc6   :  { %2062 = vmatprep.subr.bf16.mxu0 %v2228_v1 }
0x1c80   :  { %v1458_v35 = vpop.f32.mrf.mxu0 }
0x1c81   :  { %v1459_v45 = vadd.f32 %v1458_v35, %v1415_v0 }
0x1c82   :  { %v2038_v46 = vpop.f32.mrf.mxu0 }
0x1c83   :  { %1471 = vrot.lane.b32.xlu0 %v1459_v45, %s2230_s27  ;;  %v1822_v48 = vmul.f32 -1.442695, %v1459_v45 }
0x1c84   :  { %v1461_v39 = vpop.f32.mrf.mxu0 }
0x1c85   :  { %2137 = vpow2.f32 %v1822_v48 }
0x1c86   :  { %v2039_v4 = vpop.f32.mrf.mxu0 }
0x1c92   :  { %v2138_v51 = vpop.eup %2137 }
0x1c93   :  { %v1467_v52 = vadd.f32 1.0, %v2138_v51 }
0x1c95   :  { %2139 = vrcp.f32 %v1467_v52 }
0x1ca2   :  { %v2140_v7 = vpop.eup %2139 }
0x1ca3   :  { %v1481_v50 = vsub.f32 1.0, %v2140_v7  ;;  %v1487_v62 = vmul.f32 %v2140_v7, %v2541_v59  ;;  %v2185_v59 = vld [vmem:[#allocation4 + $0x18] sm:$0xff]  }
0x1cf5   :  { %v1472_v43 = vpop.permute.xlu0 %1471 }
0x1cf6   :  { %v1474_v53 = vmul.f32 %v2140_v7, %v1472_v43 }
0x1cf8   :  { %1476 = vrot.lane.b32.xlu1 %v1474_v53, %s2226_s0 }
0x1d6a   :  { %v1477_v55 = vpop.permute.xlu1 %1476 }
0x1d6b   :  { %v1479_v57 = vadd.f32 %v1477_v55, %v1459_v45 }
0x1d6d   :  { %2141 = vtanh.f32 %v1479_v57 }
0x1d7a   :  { %v2142_v58 = vpop.eup %2141 }
0x1d7b   :  { %1483 = vrot.lane.b32.xlu1 %v2142_v58, %s2231_s28 }
0x1ded   :  { %v1484_v60 = vpop.permute.xlu1 %1483 }
0x1dee   :  { %v1486_v56 = vmul.f32 %v1484_v60, %v1481_v50 }
0x1df0   :  { %v2582_v0 = vadd.f32 %v1487_v62, %v1486_v56 }
0x1df2   :  { %v1489_v6 = vpack.c.bf16 %v2582_v0, %v2582_v0 }
0x1df4   :  { %1491 = vrot.lane.b32.xlu1 %v1489_v6, %s2231_s28 }
0x1e66   :  { %v1492_v8 = vpop.permute.xlu1 %1491 }
0x1e67   :  { %2045 = vmatmul.mubr.msk.bf16.vlgmr.msra.gmra.mxu1 %vm122_vm3, %v1492_v8  ;;  %2053 = vmatmul.mubr.msk.bf16.vlgmr.msra.gmra.mxu0 %vm122_vm3, %v1492_v8 }
0x1e68   :  { %2057 = vmatpush3.bf16.msra.mxu1 %v2548_v63  ;;  %2058 = vmatprep.mubr.msk.bf16.mxu1 %vm2229_vm0, %v2228_v1  ;;  %v2600_v63 = vld [vmem:[%s2706_s2 + $0x4] ss:$0 sm:$0xff] }
0x1e69   :  { %2063 = vmatpush3.bf16.msra.mxu0 %v2184_v27  ;;  %2066 = vmatprep.mubr.msk.bf16.mxu0 %vm2229_vm0, %v2228_v1  ;;  %v1566_v27 = vstv %s1565_s22 }
0x1e6a   :  { %2064 = vmatprep.subr.bf16.mxu0 %v2228_v1  ;;  %vm1567_vm14 = vcmp.eq.s32.totalorder %v1566_v27, 1 }
0x1e6d   :  { %2065 = vmatpush3.bf16.msra.mxu0 %v2185_v59 }
0x1f27   :  { %v1530_v10 = vpop.f32.mrf.mxu1  ;;  %v2595_v11 = vpop.f32.mrf.mxu0 }
0x1f28   :  { %v1531_v12 = vadd.f32 %v2600_v63, %v1530_v10 }
0x1f29   :  { %v2046_v13 = vpop.f32.mrf.mxu1  ;;  %v2054_v29 = vpop.f32.mrf.mxu0 }
0x1f2a   :  { %vm1537_vm11 = vcmp.lt.s32.totalorder %v1531_v12, 0  ;;  %v1538_v14 = vxor.u32 2147483647, %v1531_v12 }
0x1f2b   :  { %v1533_v15 = vpop.f32.mrf.mxu1  ;;  %v1624_v16 = vpop.f32.mrf.mxu0 }
0x1f2c   :  { %v1539_v38 = vsel %vm1537_vm11, %v1538_v14, %v1531_v12 }
0x1f2d   :  { %v2047_v17 = vpop.f32.mrf.mxu1  ;;  %v2055_v18 = vpop.f32.mrf.mxu0  ;;  %v1540_v19 = vand.u32 4294967280, %v1539_v38 }
0x1f2f   :  { %v1541_v20 = vor.u32 %v1540_v19, %v2351_v47  ;;  %v1569_v47 = vsel %vm310_vm5, %v1531_v12, -inf }
0x1f31   :  { %v1542_v21 = vsel %vm310_vm5, %v1541_v20, 2147483648 }
0x1f32   :  { %v1544_v22 = vshra.s32 %v1542_v21, 16  ;;  %v1543_v30 = vand.u32 65535, %v1542_v21 }
0x1f34   :  { %v1546_v23 = vcvt.s32.f32 %v1544_v22  ;;  %v1545_v31 = vcvt.s32.f32 %v1543_v30 }
0x1f36   :  { %1547 = vmax.xlane.f32.xlu0 %v1546_v23 }
0x1f4c   :  { %99 = vperm.xlu0 %2095, %v2187_v24  }
0x1f6b   :  { %746 = vmax.xlane.f32.xlu0 %v745_v25 }
0x1f6f   :  { %1158 = vmax.xlane.f32.xlu0 %v1157_v26 }
0x1f73   :  { %1570 = vmax.xlane.f32.xlu0 %v1569_v47 }
0x1f77   :  { %339 = vmax.xlane.f32.xlu0 %v338_v28 }
0x1fbf   :  { %v1548_v61 = vpop.xlane.xlu0 %1547 }
0x1fc0   :  { %vm1549_vm0 = vcmp.eq.f32.partialorder %v1546_v23, %v1548_v61 }
0x1fc1   :  { %v1550_v32 = vsel %vm1549_vm0, %v1545_v31, -inf }
0x1fc2   :  { %1551 = vmax.xlane.f32.xlu1 %v1550_v32 }
0x1fc7   :  { %v100_v33 = vpop.permute.xlu0 %99 }
0x1fc8   :  { %vm101_vm12 = vcmp.eq.s32.totalorder %v2280_v2, %v100_v33 }
0x1fc9   :  { %v1778_v6 = vsel %vm101_vm12, 1.0, %v2228_v1 }
0x1fca   :  { %v104_v59 = vpack.c.bf16 %v1778_v6, %v1778_v6 }
0x1ff4   :  { %v747_v34 = vpop.xlane.xlu0 %746 }
0x1ff5   :  { %v748_v36 = vsub.f32 %v2436_v49, %v747_v34 }
0x1ff7   :  { %v749_v37 = vmul.f32 1.442695, %v748_v36 }
0x1ff8   :  { %v1159_v40 = vpop.xlane.xlu0 %1158 }
0x1ff9   :  { %2143 = vpow2.f32 %v749_v37  ;;  %v2617_v42 = vsub.f32 %v2518_v5, %v1159_v40 }
0x1ffb   :  { %v1161_v35 = vmul.f32 1.442695, %v2617_v42 }
0x1ffc   :  { %v1571_v45 = vpop.xlane.xlu0 %1570 }
0x1ffd   :  { %2145 = vpow2.f32 %v1161_v35  ;;  %v2620_v46 = vsub.f32 %v1531_v12, %v1571_v45  ;;  %v539_v35 = vsel %vm310_vm5, %v2395_v44, -inf  ;;  %v951_v45 = vsel %vm310_vm5, %v2477_v54, -inf }
0x1fff   :  { %v1573_v39 = vmul.f32 1.442695, %v2620_v46 }
0x2000   :  { %v340_v4 = vpop.xlane.xlu0 %339 }
0x2001   :  { %2147 = vpow2.f32 %v1573_v39  ;;  %v341_v48 = vsub.f32 %v2346_v41, %v340_v4  ;;  %v1554_v41 = vcvt.f32.s32 %v1548_v61  ;;  %v1363_v39 = vsel %vm310_vm5, %v2561_v3, -inf }
0x2003   :  { %v342_v51 = vmul.f32 1.442695, %v341_v48  ;;  %v1555_v50 = vshll.u32 %v1554_v41, 16 }
0x2005   :  { %2149 = vpow2.f32 %v342_v51 }
0x2006   :  { %v2144_v49 = vpop.eup %2143 }
0x2007   :  { %v751_v52 = vsel %vm310_vm5, %v2144_v49, 0.0 }
0x2008   :  { %752 = vadd.xlane.f32.xlu0 %v751_v52 }
0x200a   :  { %v2146_v5 = vpop.eup %2145 }
0x200b   :  { %v1163_v7 = vsel %vm310_vm5, %v2146_v5, 0.0 }
0x200c   :  { %1164 = vadd.xlane.f32.xlu0 %v1163_v7 }
0x200e   :  { %v2148_v43 = vpop.eup %2147 }
0x200f   :  { %v1575_v53 = vsel %vm310_vm5, %v2148_v43, 0.0 }
0x2010   :  { %1576 = vadd.xlane.f32.xlu0 %v1575_v53 }
0x2012   :  { %v2150_v55 = vpop.eup %2149 }
0x2013   :  { %v344_v57 = vsel %vm310_vm5, %v2150_v55, 0.0 }
0x2014   :  { %345 = vadd.xlane.f32.xlu0 %v344_v57 }
0x204b   :  { %v1552_v58 = vpop.xlane.xlu1 %1551 }
0x204c   :  { %v1553_v60 = vcvt.f32.s32 %v1552_v58 }
0x204e   :  { %v1556_v62 = vadd.s32 %v1555_v50, %v1553_v60 }
0x2050   :  { %v1557_v56 = vand.u32 15, %v1556_v62 }
0x2052   :  { %v1558_v8 = vsub.s32 15, %v1557_v56 }
0x2054   :  { %vm1559_vm13 = vcmp.eq.s32.totalorder %v2280_v2, %v1558_v8 }
0x2055   :  { %v1824_v9 = vsel %vm1559_vm13, 1.0, %v2228_v1 }
0x2056   :  { %v1562_v10 = vpack.c.bf16 %v1824_v9, %v1824_v9 }
0x2058   :  { %v1568_v12 = vsel %vm1567_vm14, %v104_v59, %v1562_v10 }
0x2059   :  { %2059 = vmatmul.mubr.msk.bf16.vlgmr.msra.gmra.mxu1 %vm172_vm2, %v1568_v12  ;;  %vm555_vm2 = vcmask 257152  }
0x2091   :  { %v753_v13 = vpop.xlane.xlu0 %752 }
0x2092   :  { %2151 = vlog2.f32 %v753_v13 }
0x2095   :  { %v2633_v29 = vpop.xlane.xlu0 %1164 }
0x2099   :  { %v2635_v14 = vpop.xlane.xlu0 %1576 }
0x209d   :  { %v346_v15 = vpop.xlane.xlu0 %345 }
0x209e   :  { %2153 = vlog2.f32 %v346_v15 }
0x209f   :  { %v2152_v16 = vpop.eup %2151 }
0x20a0   :  { %v755_v38 = vmul.f32 0.6931472, %v2152_v16 }
0x20a2   :  { %v756_v17 = vsub.f32 %v748_v36, %v755_v38 }
0x20a4   :  { %758 = vrot.lane.b32.xlu0 %v756_v17, %s2230_s27 }
0x20ab   :  { %v2154_v2 = vpop.eup %2153 }
0x20ac   :  { %v348_v1 = vmul.f32 0.6931472, %v2154_v2 }
0x20ae   :  { %v349_v18 = vsub.f32 %v341_v48, %v348_v1 }
0x20b0   :  { %350 = vst.msk [vmem:[%s2708_s4] sm:$0xf] %vm310_vm5, %v349_v18 }
0x2119   :  { %v1664_v19 = vpop.f32.mrf.mxu1 }
0x211a   :  { %v1665_v20 = vadd.f32 %v1664_v19, %v2595_v11 }
0x211b   :  { %v2060_v21 = vpop.f32.mrf.mxu1 }
0x211c   :  { %1677 = vrot.lane.b32.xlu1 %v1665_v20, %s2230_s27  ;;  %v1828_v24 = vmul.f32 -1.442695, %v1665_v20 }
0x211d   :  { %v1667_v22 = vpop.f32.mrf.mxu1 }
0x211e   :  { %2155 = vpow2.f32 %v1828_v24 }
0x211f   :  { %v2061_v23 = vpop.f32.mrf.mxu1 }
0x212b   :  { %v2156_v25 = vpop.eup %2155 }
0x212c   :  { %v1673_v26 = vadd.f32 1.0, %v2156_v25 }
0x212e   :  { %2157 = vrcp.f32 %v1673_v26 }
0x213b   :  { %v2158_v47 = vpop.eup %2157 }
0x213c   :  { %v1687_v11 = vsub.f32 1.0, %v2158_v47  ;;  %v1693_v34 = vmul.f32 %v2158_v47, %v2582_v0 }
0x218e   :  { %v1678_v28 = vpop.permute.xlu1 %1677 }
0x218f   :  { %v1680_v30 = vmul.f32 %v2158_v47, %v1678_v28  ;;  %v759_v47 = vpop.permute.xlu0 %758 }
0x2191   :  { %1682 = vrot.lane.b32.xlu1 %v1680_v30, %s2226_s0 }
0x2203   :  { %v1683_v61 = vpop.permute.xlu1 %1682 }
0x2204   :  { %v1685_v31 = vadd.f32 %v1683_v61, %v1665_v20 }
0x2206   :  { %2159 = vtanh.f32 %v1685_v31 }
0x2213   :  { %v2160_v32 = vpop.eup %2159 }
0x2214   :  { %1689 = vrot.lane.b32.xlu1 %v2160_v32, %s2231_s28 }
0x2286   :  { %v1690_v33 = vpop.permute.xlu1 %1689 }
0x2287   :  { %v1692_v36 = vmul.f32 %v1690_v33, %v1687_v11 }
0x2289   :  { %v2647_v37 = vadd.f32 %v1693_v34, %v1692_v36 }
0x228b   :  { %v1695_v40 = vpack.c.bf16 %v2647_v37, %v2647_v37 }
0x228d   :  { %1697 = vrot.lane.b32.xlu1 %v1695_v40, %s2231_s28 }
0x22b1   :  { %540 = vmax.xlane.f32.xlu1 %v539_v35 }
0x22b5   :  { %952 = vmax.xlane.f32.xlu1 %v951_v45 }
0x22b9   :  { %1364 = vmax.xlane.f32.xlu1 %v1363_v39 }
0x22ff   :  { %v1698_v0 = vpop.permute.xlu1 %1697 }
0x2300   :  { %2067 = vmatmul.mubr.msk.bf16.vlgmr.msra.gmra.mxu0 %vm122_vm3, %v1698_v0  ;;  %vm761_vm3 = vcmask 388352  }
0x233a   :  { %v541_v4 = vpop.xlane.xlu1 %540 }
0x233b   :  { %v542_v51 = vsub.f32 %v2395_v44, %v541_v4 }
0x233d   :  { %v543_v49 = vmul.f32 1.442695, %v542_v51 }
0x233e   :  { %v953_v48 = vpop.xlane.xlu1 %952 }
0x233f   :  { %v954_v52 = vsub.f32 %v2477_v54, %v953_v48  ;;  %2161 = vpow2.f32 %v543_v49 }
0x2341   :  { %v955_v7 = vmul.f32 1.442695, %v954_v52 }
0x2342   :  { %v1365_v5 = vpop.xlane.xlu1 %1364 }
0x2343   :  { %v1366_v43 = vsub.f32 %v2561_v3, %v1365_v5  ;;  %2163 = vpow2.f32 %v955_v7 }
0x2345   :  { %v1367_v53 = vmul.f32 1.442695, %v1366_v43 }
0x2347   :  { %2165 = vpow2.f32 %v1367_v53 }
0x234c   :  { %v2162_v50 = vpop.eup %2161 }
0x234d   :  { %v545_v54 = vsel %vm310_vm5, %v2162_v50, 0.0 }
0x2350   :  { %v2164_v62 = vpop.eup %2163 }
0x2351   :  { %v957_v56 = vsel %vm310_vm5, %v2164_v62, 0.0 }
0x2354   :  { %v2166_v3 = vpop.eup %2165 }
0x2355   :  { %v1369_v6 = vsel %vm310_vm5, %v2166_v3, 0.0 }
0x23c0   :  { %v1736_v55 = vpop.f32.mrf.mxu0 }
0x23c1   :  { %v1737_v57 = vadd.f32 %v2600_v63, %v1736_v55 }
0x23c2   :  { %v2068_v41 = vpop.f32.mrf.mxu0 }
0x23c3   :  { %v1742_v58 = vsel %vm310_vm5, %v1737_v57, -inf }
0x23c4   :  { %1743 = vmax.xlane.f32.xlu1 %v1742_v58  ;;  %v1739_v44 = vpop.f32.mrf.mxu0 }
0x23c6   :  { %v2069_v60 = vpop.f32.mrf.mxu0 }
0x23c8   :  { %546 = vadd.xlane.f32.xlu1 %v545_v54 }
0x23cc   :  { %958 = vadd.xlane.f32.xlu1 %v957_v56 }
0x23d0   :  { %1370 = vadd.xlane.f32.xlu1 %v1369_v6 }
0x244d   :  { %v1744_v8 = vpop.xlane.xlu1 %1743 }
0x244e   :  { %v2667_v63 = vsub.f32 %v1737_v57, %v1744_v8 }
0x2450   :  { %v1746_v27 = vmul.f32 1.442695, %v2667_v63 }
0x2451   :  { %v547_v59 = vpop.xlane.xlu1 %546 }
0x2452   :  { %2167 = vpow2.f32 %v1746_v27 }
0x2455   :  { %v959_v9 = vpop.xlane.xlu1 %958 }
0x2459   :  { %v1371_v10 = vpop.xlane.xlu1 %1370 }
0x245a   :  { %2169 = vlog2.f32 %v1371_v10 }
0x245b   :  { %2171 = vlog2.f32 %v547_v59 }
0x245c   :  { %2173 = vlog2.f32 %v959_v9 }
0x245d   :  { %2175 = vlog2.f32 %v2633_v29 }
0x245e   :  { %2177 = vlog2.f32 %v2635_v14 }
0x245f   :  { %v2168_v12 = vpop.eup %2167 }
0x2460   :  { %v1748_v13 = vsel %vm310_vm5, %v2168_v12, 0.0  ;;  %vm967_vm5 = vcmask 519552  }
0x2461   :  { %1749 = vadd.xlane.f32.xlu1 %v1748_v13 }
0x2467   :  { %v2170_v15 = vpop.eup %2169 }
0x2468   :  { %v1373_v16 = vmul.f32 0.6931472, %v2170_v15  ;;  %v2172_v38 = vpop.eup %2171 }
0x2469   :  { %v549_v2 = vmul.f32 0.6931472, %v2172_v38  ;;  %v2174_v1 = vpop.eup %2173 }
0x246a   :  { %v1374_v17 = vsub.f32 %v1366_v43, %v1373_v16  ;;  %v961_v18 = vmul.f32 0.6931472, %v2174_v1  ;;  %v2176_v20 = vpop.eup %2175 }
0x246b   :  { %v550_v19 = vsub.f32 %v542_v51, %v549_v2  ;;  %v1167_v22 = vmul.f32 0.6931472, %v2176_v20  ;;  %v2178_v23 = vpop.eup %2177 }
0x246c   :  { %1376 = vrot.lane.b32.xlu0 %v1374_v17, %s2239_s25  ;;  %v962_v21 = vsub.f32 %v954_v52, %v961_v18  ;;  %v1579_v29 = vmul.f32 0.6931472, %v2178_v23 }
0x246d   :  { %v1168_v14 = vsub.f32 %v2617_v42, %v1167_v22 }
0x246e   :  { %v1580_v24 = vsub.f32 %v2620_v46, %v1579_v29 }
0x2472   :  { %552 = vrot.lane.b32.xlu1 %v550_v19, %s2240_s1 }
0x2476   :  { %964 = vrot.lane.b32.xlu1 %v962_v21, %s2241_s26 }
0x247a   :  { %1170 = vrot.lane.b32.xlu1 %v1168_v14, %s2226_s0 }
0x247e   :  { %1582 = vrot.lane.b32.xlu1 %v1580_v24, %s2231_s28 }
0x2482   :  { %1761 = vrot.lane.b32.xlu1 %v2647_v37, %s2231_s28 }
0x24de   :  { %v1377_v28 = vpop.permute.xlu0 %1376 }
0x24ea   :  { %v1750_v25 = vpop.xlane.xlu1 %1749 }
0x24eb   :  { %2179 = vlog2.f32 %v1750_v25 }
0x24ee   :  { %v553_v26 = vpop.permute.xlu1 %552 }
0x24ef   :  { %556 = vst.msk [vmem:[%s2708_s4] sm:$0xf] %vm555_vm2, %v553_v26 }
0x24f0   :  { %762 = vst.msk [vmem:[%s2708_s4] sm:$0xf] %vm761_vm3, %v759_v47 }
0x24f2   :  { %v965_v42 = vpop.permute.xlu1 %964 }
0x24f3   :  { %968 = vst.msk [vmem:[%s2708_s4] sm:$0xf] %vm967_vm5, %v965_v42 }
0x24f6   :  { %v1171_v46 = vpop.permute.xlu1 %1170 }
0x24f7   :  { %1174 = vst.msk [vmem:[%s2708_s4] sm:$0xf] %vm1173_vm15, %v1171_v46 }
0x24f8   :  { %v2180_v30 = vpop.eup %2179  ;;  %1380 = vst.msk [vmem:[%s2708_s4] sm:$0xf] %vm1379_vm1, %v1377_v28 }
0x24f9   :  { %v1752_v61 = vmul.f32 0.6931472, %v2180_v30 }
0x24fa   :  { %v1583_v31 = vpop.permute.xlu1 %1582 }
0x24fb   :  { %1586 = vst.msk [vmem:[%s2708_s4] sm:$0xf] %vm1585_vm4, %v1583_v31  ;;  %v1753_v32 = vsub.f32 %v2667_v63, %v1752_v61 }
0x24fd   :  { %1755 = vrot.lane.b32.xlu0 %v1753_v32, %s2242_s12 }
0x24fe   :  { %v1762_v11 = vpop.permute.xlu1 %1761 }
0x24ff   :  { %1765 = vst.msk [vmem:[%s2708_s4 + $0x4] sm:$0xf] %vm1764_vm6, %v1762_v11 }
0x256f   :  { %v1756_v33 = vpop.permute.xlu0 %1755 }
0x2570   :  { %1759 = vst.msk [vmem:[%s2708_s4] sm:$0xf] %vm1758_vm7, %v1756_v33 }
0x2571   :  { %1770 = vsyncpa [#allocation5], 1 }

</bundles_post_ra>
